<compile_context>
chip_gen: v6e
topology: v6e:2x2x1
jax: 0.10.0
libtpu: 0.0.40
codegen_flags: <defaults>
</compile_context>

<pallas_src>
import functools

import jax
import jax.numpy as jnp
from jax.experimental import pallas as pl
from jax.experimental.pallas import tpu as pltpu

N_INPUT = 784
N2 = 392
N_BOTTLENECK = 8
N_OUTPUT = 784

N2_PAD = 512  # lane-dense (4 * 128) padded hidden dim


def _round_up(x, m):
    return (x + m - 1) // m * m


def _pad2(a, rows, cols):
    r, c = a.shape
    return jnp.pad(a, ((0, rows - r), (0, cols - c)))


def _ae_kernel(x_ref, w1_ref, b1_ref, w2_ref, b2_ref,
               w3_ref, b3_ref, w4_ref, b4_ref, o_ref):
    # x arrives as raw f32; cast to bf16 in-kernel (VPU), accumulate in f32 on
    # the MXU, bias/ReLU/sigmoid in f32, recast activations to bf16 between dots.
    x = x_ref[...].astype(jnp.bfloat16)

    h1 = jnp.dot(x, w1_ref[...],
                 preferred_element_type=jnp.float32) + b1_ref[...]
    h1 = jnp.maximum(h1, 0.0).astype(jnp.bfloat16)

    # Bottleneck dots are tiny (K/N = 8); left unpadded on purpose.
    z = jnp.dot(h1, w2_ref[...],
                preferred_element_type=jnp.float32) + b2_ref[...]
    z = jnp.maximum(z, 0.0).astype(jnp.bfloat16)

    h3 = jnp.dot(z, w3_ref[...],
                 preferred_element_type=jnp.float32) + b3_ref[...]
    h3 = jnp.maximum(h3, 0.0).astype(jnp.bfloat16)

    y = jnp.dot(h3, w4_ref[...],
                preferred_element_type=jnp.float32) + b4_ref[...]
    o_ref[...] = jax.nn.sigmoid(y).astype(o_ref.dtype)


def prepare_params(params):
    """One-time weight prep: pad hidden dim 392->512 (lane-dense), cast to bf16.
    Padded rows/cols are zero so results are bit-identical to the unpadded math.
    Weights are (in_features, out_features); biases (1, out_features)."""
    w1, b1, w2, b2, w3, b3, w4, b4 = params
    w1p = _pad2(w1, N_INPUT, N2_PAD).astype(jnp.bfloat16)      # (784, 512)
    b1p = _pad2(b1, 1, N2_PAD)                                  # (1, 512) f32
    w2p = _pad2(w2, N2_PAD, N_BOTTLENECK).astype(jnp.bfloat16)  # (512, 8)
    b2p = b2                                                    # (1, 8) f32
    w3p = _pad2(w3, N_BOTTLENECK, N2_PAD).astype(jnp.bfloat16)  # (8, 512)
    b3p = _pad2(b3, 1, N2_PAD)                                  # (1, 512) f32
    w4p = _pad2(w4, N2_PAD, N_OUTPUT).astype(jnp.bfloat16)      # (512, 784)
    b4p = b4                                                    # (1, 784) f32
    return (w1p, b1p, w2p, b2p, w3p, b3p, w4p, b4p)


def _choose_tile_b(B, tile_b):
    bp8 = _round_up(B, 8)
    tb = min(tile_b, bp8)
    # Prefer >=2 batch tiles when the batch can be split so the "parallel"
    # grid axis shards across both TensorCores on dual-TC chips (v7x).
    if bp8 > 8:
        tb = min(tb, _round_up(-(-bp8 // 2), 8))
    return tb


@functools.partial(jax.jit, static_argnames=("tile_b",))
def autoencoder_mlp4_forward(x, prepared_params, *, tile_b=1024):
    """x: (B, 1, 28, 28) or (B, 784) float32.  prepared_params from
    prepare_params().  Returns (B, 784) float32 (sigmoid outputs)."""
    B = x.shape[0]
    x2d = x.reshape(B, -1).astype(jnp.float32)  # nn.Flatten(); reshape is free

    TB = _choose_tile_b(B, tile_b)
    Bp = _round_up(B, TB)
    if Bp != B:  # only materialize a row-pad when the batch is ragged
        x2d = jnp.pad(x2d, ((0, Bp - B), (0, 0)))

    w1p, b1p, w2p, b2p, w3p, b3p, w4p, b4p = prepared_params

    def const(shape):
        return pl.BlockSpec(shape, lambda i: (0, 0))

    out = pl.pallas_call(
        _ae_kernel,
        out_shape=jax.ShapeDtypeStruct((Bp, N_OUTPUT), jnp.float32),
        grid=(Bp // TB,),
        in_specs=[
            pl.BlockSpec((TB, N_INPUT), lambda i: (i, 0)),       # x: streamed f32
            const((N_INPUT, N2_PAD)), const((1, N2_PAD)),        # fc1 (resident)
            const((N2_PAD, N_BOTTLENECK)), const((1, N_BOTTLENECK)),  # fc2
            const((N_BOTTLENECK, N2_PAD)), const((1, N2_PAD)),   # fc3
            const((N2_PAD, N_OUTPUT)), const((1, N_OUTPUT)),     # fc4
        ],
        out_specs=pl.BlockSpec((TB, N_OUTPUT), lambda i: (i, 0)),
        compiler_params=pltpu.CompilerParams(
            dimension_semantics=("parallel",),
            vmem_limit_bytes=48 * 1024 * 1024),
    )(x2d, w1p, b1p, w2p, b2p, w3p, b3p, w4p, b4p)

    if Bp != B:
        out = out[:B]
    return out


def init_params(key):
    """PyTorch nn.Linear-style init: U(-1/sqrt(fan_in), 1/sqrt(fan_in)).
    Weights stored as (in_features, out_features); biases as (1, out)."""
    def linear(key, fan_in, fan_out):
        kw, kb = jax.random.split(key)
        bound = 1.0 / jnp.sqrt(fan_in)
        w = jax.random.uniform(kw, (fan_in, fan_out), jnp.float32, -bound, bound)
        b = jax.random.uniform(kb, (1, fan_out), jnp.float32, -bound, bound)
        return w, b

    k1, k2, k3, k4 = jax.random.split(key, 4)
    w1, b1 = linear(k1, N_INPUT, N2)
    w2, b2 = linear(k2, N2, N_BOTTLENECK)
    w3, b3 = linear(k3, N_BOTTLENECK, N2)
    w4, b4 = linear(k4, N2, N_OUTPUT)
    return (w1, b1, w2, b2, w3, b3, w4, b4)


def _reference(x, params):
    """Pure-JAX reference mirroring the kernel's bf16-input / f32-accumulate
    numerics (precision=HIGHEST so XLA doesn't further down-convert)."""
    w1, b1, w2, b2, w3, b3, w4, b4 = params
    hp = jax.lax.Precision.HIGHEST
    bf = jnp.bfloat16

    h = x.reshape(x.shape[0], -1).astype(bf)
    h = jnp.maximum(jnp.dot(h, w1.astype(bf), precision=hp,
                            preferred_element_type=jnp.float32) + b1, 0.0).astype(bf)
    z = jnp.maximum(jnp.dot(h, w2.astype(bf), precision=hp,
                            preferred_element_type=jnp.float32) + b2, 0.0).astype(bf)
    h = jnp.maximum(jnp.dot(z, w3.astype(bf), precision=hp,
                            preferred_element_type=jnp.float32) + b3, 0.0).astype(bf)
    y = jnp.dot(h, w4.astype(bf), precision=hp,
                preferred_element_type=jnp.float32) + b4
    return jax.nn.sigmoid(y)


if __name__ == "__main__":
    key = jax.random.PRNGKey(0)
    kx, kp = jax.random.split(key)

    B = 8
    x = jax.random.normal(kx, (B, 1, 28, 28), dtype=jnp.float32)
    raw_params = init_params(kp)
    params = prepare_params(raw_params)

    out = autoencoder_mlp4_forward(x, params)
    out = jax.block_until_ready(out)

    ref = _reference(x, raw_params)
    assert out.shape == (B, N_OUTPUT), out.shape
    assert jnp.allclose(out, ref, atol=1e-3, rtol=1e-3), "mismatch vs reference"

    print("KERNEL_OK")
</pallas_src>

<mosaic_0001>
module attributes {stable_mosaic.version = 11 : i64} {
  func.func @_ae_kernel(%arg0: i32, %arg1: memref<8x784xf32, #tpu.memory_space<vmem>>, %arg2: memref<784x512xbf16, #tpu.memory_space<vmem>>, %arg3: memref<1x512xf32, #tpu.memory_space<vmem>>, %arg4: memref<512x8xbf16, #tpu.memory_space<vmem>>, %arg5: memref<1x8xf32, #tpu.memory_space<vmem>>, %arg6: memref<8x512xbf16, #tpu.memory_space<vmem>>, %arg7: memref<1x512xf32, #tpu.memory_space<vmem>>, %arg8: memref<512x784xbf16, #tpu.memory_space<vmem>>, %arg9: memref<1x784xf32, #tpu.memory_space<vmem>>, %arg10: memref<8x784xf32, #tpu.memory_space<vmem>>) attributes {dimension_semantics = [#tpu.dimension_semantics<parallel>], iteration_bounds = array<i64: 1>, scalar_prefetch = 0 : i64, scratch_operands = 0 : i64, tpu.core_type = #tpu.core_type<tc>, window_params = [{transform_indices = @transform_0, window_bounds = array<i64: 8, 784>}, {pipeline_mode = #tpu.pipeline_mode<synchronous>, transform_indices = @transform_1, window_bounds = array<i64: 784, 512>}, {pipeline_mode = #tpu.pipeline_mode<synchronous>, transform_indices = @transform_2, window_bounds = array<i64: 1, 512>}, {pipeline_mode = #tpu.pipeline_mode<synchronous>, transform_indices = @transform_3, window_bounds = array<i64: 512, 8>}, {pipeline_mode = #tpu.pipeline_mode<synchronous>, transform_indices = @transform_4, window_bounds = array<i64: 1, 8>}, {pipeline_mode = #tpu.pipeline_mode<synchronous>, transform_indices = @transform_5, window_bounds = array<i64: 8, 512>}, {pipeline_mode = #tpu.pipeline_mode<synchronous>, transform_indices = @transform_6, window_bounds = array<i64: 1, 512>}, {pipeline_mode = #tpu.pipeline_mode<synchronous>, transform_indices = @transform_7, window_bounds = array<i64: 512, 784>}, {pipeline_mode = #tpu.pipeline_mode<synchronous>, transform_indices = @transform_8, window_bounds = array<i64: 1, 784>}, {transform_indices = @transform_9, window_bounds = array<i64: 8, 784>}]} {
    %c0 = arith.constant 0 : index
    %c0_0 = arith.constant 0 : index
    %0 = vector.load %arg1[%c0, %c0_0] : memref<8x784xf32, #tpu.memory_space<vmem>>, vector<8x784xf32>
    %1 = arith.truncf %0 : vector<8x784xf32> to vector<8x784xbf16>
    %c0_1 = arith.constant 0 : index
    %c0_2 = arith.constant 0 : index
    %2 = vector.load %arg2[%c0_1, %c0_2] : memref<784x512xbf16, #tpu.memory_space<vmem>>, vector<784x512xbf16>
    %cst = arith.constant dense<0.000000e+00> : vector<8x512xf32>
    %3 = tpu.matmul %1, %2, %cst {dimension_numbers = #tpu.dot_dimension_numbers<[1], [0], [0], [1], [0, 0, 1, 1], [], []>} : vector<8x784xbf16>, vector<784x512xbf16>, vector<8x512xf32> -> vector<8x512xf32>
    %c0_3 = arith.constant 0 : index
    %c0_4 = arith.constant 0 : index
    %4 = vector.load %arg3[%c0_3, %c0_4] : memref<1x512xf32, #tpu.memory_space<vmem>>, vector<1x512xf32>
    %5 = vector.broadcast %4 : vector<1x512xf32> to vector<8x512xf32>
    %6 = arith.addf %3, %5 : vector<8x512xf32>
    %cst_5 = arith.constant 0.000000e+00 : f32
    %7 = vector.broadcast %cst_5 : f32 to vector<8x512xf32>
    %8 = arith.maximumf %6, %7 : vector<8x512xf32>
    %9 = arith.truncf %8 : vector<8x512xf32> to vector<8x512xbf16>
    %c0_6 = arith.constant 0 : index
    %c0_7 = arith.constant 0 : index
    %10 = vector.load %arg4[%c0_6, %c0_7] : memref<512x8xbf16, #tpu.memory_space<vmem>>, vector<512x8xbf16>
    %cst_8 = arith.constant dense<0.000000e+00> : vector<8x8xf32>
    %11 = tpu.matmul %9, %10, %cst_8 {dimension_numbers = #tpu.dot_dimension_numbers<[1], [0], [0], [1], [0, 0, 1, 1], [], []>} : vector<8x512xbf16>, vector<512x8xbf16>, vector<8x8xf32> -> vector<8x8xf32>
    %c0_9 = arith.constant 0 : index
    %c0_10 = arith.constant 0 : index
    %12 = vector.load %arg5[%c0_9, %c0_10] : memref<1x8xf32, #tpu.memory_space<vmem>>, vector<1x8xf32>
    %13 = vector.broadcast %12 : vector<1x8xf32> to vector<8x8xf32>
    %14 = arith.addf %11, %13 : vector<8x8xf32>
    %cst_11 = arith.constant 0.000000e+00 : f32
    %15 = vector.broadcast %cst_11 : f32 to vector<8x8xf32>
    %16 = arith.maximumf %14, %15 : vector<8x8xf32>
    %17 = arith.truncf %16 : vector<8x8xf32> to vector<8x8xbf16>
    %c0_12 = arith.constant 0 : index
    %c0_13 = arith.constant 0 : index
    %18 = vector.load %arg6[%c0_12, %c0_13] : memref<8x512xbf16, #tpu.memory_space<vmem>>, vector<8x512xbf16>
    %cst_14 = arith.constant dense<0.000000e+00> : vector<8x512xf32>
    %19 = tpu.matmul %17, %18, %cst_14 {dimension_numbers = #tpu.dot_dimension_numbers<[1], [0], [0], [1], [0, 0, 1, 1], [], []>} : vector<8x8xbf16>, vector<8x512xbf16>, vector<8x512xf32> -> vector<8x512xf32>
    %c0_15 = arith.constant 0 : index
    %c0_16 = arith.constant 0 : index
    %20 = vector.load %arg7[%c0_15, %c0_16] : memref<1x512xf32, #tpu.memory_space<vmem>>, vector<1x512xf32>
    %21 = vector.broadcast %20 : vector<1x512xf32> to vector<8x512xf32>
    %22 = arith.addf %19, %21 : vector<8x512xf32>
    %cst_17 = arith.constant 0.000000e+00 : f32
    %23 = vector.broadcast %cst_17 : f32 to vector<8x512xf32>
    %24 = arith.maximumf %22, %23 : vector<8x512xf32>
    %25 = arith.truncf %24 : vector<8x512xf32> to vector<8x512xbf16>
    %c0_18 = arith.constant 0 : index
    %c0_19 = arith.constant 0 : index
    %26 = vector.load %arg8[%c0_18, %c0_19] : memref<512x784xbf16, #tpu.memory_space<vmem>>, vector<512x784xbf16>
    %cst_20 = arith.constant dense<0.000000e+00> : vector<8x784xf32>
    %27 = tpu.matmul %25, %26, %cst_20 {dimension_numbers = #tpu.dot_dimension_numbers<[1], [0], [0], [1], [0, 0, 1, 1], [], []>} : vector<8x512xbf16>, vector<512x784xbf16>, vector<8x784xf32> -> vector<8x784xf32>
    %c0_21 = arith.constant 0 : index
    %c0_22 = arith.constant 0 : index
    %28 = vector.load %arg9[%c0_21, %c0_22] : memref<1x784xf32, #tpu.memory_space<vmem>>, vector<1x784xf32>
    %29 = vector.broadcast %28 : vector<1x784xf32> to vector<8x784xf32>
    %30 = arith.addf %27, %29 : vector<8x784xf32>
    %31 = arith.negf %30 : vector<8x784xf32>
    %32 = math.exp %31 : vector<8x784xf32>
    %cst_23 = arith.constant 1.000000e+00 : f32
    %33 = vector.broadcast %cst_23 : f32 to vector<8x784xf32>
    %34 = arith.addf %33, %32 : vector<8x784xf32>
    %35 = arith.divf %33, %34 : vector<8x784xf32>
    %c0_24 = arith.constant 0 : index
    %c0_25 = arith.constant 0 : index
    %36 = vector.load %arg10[%c0_24, %c0_25] : memref<8x784xf32, #tpu.memory_space<vmem>>, vector<8x784xf32>
    tpu.vector_store %arg10[%c0_24, %c0_25], %35 {strides = array<i32>} : memref<8x784xf32, #tpu.memory_space<vmem>>, vector<8x784xf32>,
    return
  }
  func.func @transform_0(%arg0: i32) -> (i32, i32) {
    %c0_i32 = arith.constant 0 : i32
    %c0_i32_0 = arith.constant 0 : i32
    return %arg0, %c0_i32 : i32, i32
  }
  func.func @transform_1(%arg0: i32) -> (i32, i32) {
    %c0_i32 = arith.constant 0 : i32
    %c0_i32_0 = arith.constant 0 : i32
    %c0_i32_1 = arith.constant 0 : i32
    return %c0_i32, %c0_i32_0 : i32, i32
  }
  func.func @transform_2(%arg0: i32) -> (i32, i32) {
    %c0_i32 = arith.constant 0 : i32
    %c0_i32_0 = arith.constant 0 : i32
    %c0_i32_1 = arith.constant 0 : i32
    return %c0_i32, %c0_i32_0 : i32, i32
  }
  func.func @transform_3(%arg0: i32) -> (i32, i32) {
    %c0_i32 = arith.constant 0 : i32
    %c0_i32_0 = arith.constant 0 : i32
    %c0_i32_1 = arith.constant 0 : i32
    return %c0_i32, %c0_i32_0 : i32, i32
  }
  func.func @transform_4(%arg0: i32) -> (i32, i32) {
    %c0_i32 = arith.constant 0 : i32
    %c0_i32_0 = arith.constant 0 : i32
    %c0_i32_1 = arith.constant 0 : i32
    return %c0_i32, %c0_i32_0 : i32, i32
  }
  func.func @transform_5(%arg0: i32) -> (i32, i32) {
    %c0_i32 = arith.constant 0 : i32
    %c0_i32_0 = arith.constant 0 : i32
    %c0_i32_1 = arith.constant 0 : i32
    return %c0_i32, %c0_i32_0 : i32, i32
  }
  func.func @transform_6(%arg0: i32) -> (i32, i32) {
    %c0_i32 = arith.constant 0 : i32
    %c0_i32_0 = arith.constant 0 : i32
    %c0_i32_1 = arith.constant 0 : i32
    return %c0_i32, %c0_i32_0 : i32, i32
  }
  func.func @transform_7(%arg0: i32) -> (i32, i32) {
    %c0_i32 = arith.constant 0 : i32
    %c0_i32_0 = arith.constant 0 : i32
    %c0_i32_1 = arith.constant 0 : i32
    return %c0_i32, %c0_i32_0 : i32, i32
  }
  func.func @transform_8(%arg0: i32) -> (i32, i32) {
    %c0_i32 = arith.constant 0 : i32
    %c0_i32_0 = arith.constant 0 : i32
    %c0_i32_1 = arith.constant 0 : i32
    return %c0_i32, %c0_i32_0 : i32, i32
  }
  func.func @transform_9(%arg0: i32) -> (i32, i32) {
    %c0_i32 = arith.constant 0 : i32
    %c0_i32_0 = arith.constant 0 : i32
    return %arg0, %c0_i32 : i32, i32
  }
}

</mosaic_0001>

<bundles_post_ra>
// kernel: autoencoder_mlp4_forward.1
= control target key start
LH: loop header
LB: loop body
LE: loop exit
PB: predicated region body
PF: predicated region fallthrough
CT: control target
= control target key end

     0   :  { %vm1246_vm0 = vcmask 130048   ;;  %s6713_s0 = inlined_call_operand.vmem [shape: f32[8,784], index: 0, kind: input, shape index: {}]   ;;  %s6714_s1 = inlined_call_operand.vmem [shape: bf16[784,512], index: 1, kind: input, shape index: {}]   ;;  %s6715_s2 = inlined_call_operand.vmem [shape: f32[1,512], index: 2, kind: input, shape index: {}]   ;;  %s6716_s3 = inlined_call_operand.vmem [shape: bf16[512,8], index: 3, kind: input, shape index: {}]   ;;  %s6717_s4 = inlined_call_operand.vmem [shape: f32[1,8], index: 4, kind: input, shape index: {}]   ;;  %s6718_s5 = inlined_call_operand.vmem [shape: bf16[8,512], index: 5, kind: input, shape index: {}]   ;;  %s6719_s6 = inlined_call_operand.vmem [shape: f32[1,512], index: 6, kind: input, shape index: {}]   ;;  %s6720_s7 = inlined_call_operand.vmem [shape: bf16[512,784], index: 7, kind: input, shape index: {}]   ;;  %s6721_s8 = inlined_call_operand.vmem [shape: f32[1,784], index: 8, kind: input, shape index: {}]   ;;  %s6722_s9 = inlined_call_operand.hbm [shape: f32[8,784], index: 9, kind: output, shape index: {}]  }
   0x1   :  { %v4466_v0 = vld [vmem:[%s6714_s1 + $0xe4] ss:$16 sps:$4 sm:$0xff]   ;;  %v4470_v2 = vld [vmem:[%s6714_s1 + $0xe0] ss:$16 sps:$4 sm:$0xff]   ;;  %v35_v46 = vld [vmem:[%s6713_s0 + $0x8] sm:$0xff] }
   0x2   :  { %v4468_v1 = vld [vmem:[%s6714_s1 + $0x2e4] ss:$16 sps:$4 sm:$0xff]   ;;  %1250 = vmatprep.subr.bf16.mxu0 %v4466_v0  ;;  %v4471_v3 = vld [vmem:[%s6714_s1 + $0x2e0] ss:$16 sps:$4 sm:$0xff]   ;;  %v5365_v49 = vpack.c.bf16 %v35_v46, %v35_v46  ;;  %v37_v50 = vld [vmem:[%s6713_s0 + $0x18] sm:$0xff] }
   0x3   :  { %1291 = vmatprep.subr.bf16.mxu1 %v4468_v1  ;;  %v4472_v4 = vld [vmem:[%s6714_s1 + $0xc4] ss:$16 sps:$4 sm:$0xff]   ;;  %1251 = vmatpush1.bf16.msra.mxu0 %v4470_v2  ;;  %v4476_v6 = vld [vmem:[%s6714_s1 + $0xc0] ss:$16 sps:$4 sm:$0xff]   ;;  %v5373_v52 = vpack.c.bf16 %v37_v50, %v37_v50 }
   0x4   :  { %1292 = vmatpush1.bf16.msra.mxu1 %v4471_v3  ;;  %v4474_v5 = vld [vmem:[%s6714_s1 + $0x2c4] ss:$16 sps:$4 sm:$0xff]   ;;  %1252 = vmatprep.subr.bf16.mxu0 %v4472_v4  ;;  %v4477_v7 = vld [vmem:[%s6714_s1 + $0x2c0] ss:$16 sps:$4 sm:$0xff]  }
   0x5   :  { %1293 = vmatprep.subr.bf16.mxu1 %v4474_v5  ;;  %v4478_v8 = vld [vmem:[%s6714_s1 + $0xa4] ss:$16 sps:$4 sm:$0xff]   ;;  %v4482_v10 = vld [vmem:[%s6714_s1 + $0xa0] ss:$16 sps:$4 sm:$0xff]   ;;  %1282 = vmatprep.mubr.bf16.mxu0 %v5365_v49 }
   0x6   :  { %v4480_v9 = vld [vmem:[%s6714_s1 + $0x2a4] ss:$16 sps:$4 sm:$0xff]   ;;  %v4483_v11 = vld [vmem:[%s6714_s1 + $0x2a0] ss:$16 sps:$4 sm:$0xff]   ;;  %1323 = vmatprep.mubr.bf16.mxu1 %v5373_v52 }
   0x7   :  { %1253 = vmatpush1.bf16.msra.mxu0 %v4476_v6  ;;  %v4484_v12 = vld [vmem:[%s6714_s1 + $0x84] ss:$16 sps:$4 sm:$0xff]   ;;  %v4488_v14 = vld [vmem:[%s6714_s1 + $0x80] ss:$16 sps:$4 sm:$0xff]  }
   0x8   :  { %1294 = vmatpush1.bf16.msra.mxu1 %v4477_v7  ;;  %1254 = vmatprep.subr.bf16.mxu0 %v4478_v8  ;;  %v4486_v13 = vld [vmem:[%s6714_s1 + $0x284] ss:$16 sps:$4 sm:$0xff]   ;;  %v4489_v15 = vld [vmem:[%s6714_s1 + $0x280] ss:$16 sps:$4 sm:$0xff]  }
   0x9   :  { %1295 = vmatprep.subr.bf16.mxu1 %v4480_v9  ;;  %v4490_v16 = vld [vmem:[%s6714_s1 + $0x64] ss:$16 sps:$4 sm:$0xff]   ;;  %v4494_v18 = vld [vmem:[%s6714_s1 + $0x60] ss:$16 sps:$4 sm:$0xff]  }
   0xa   :  { %v4492_v17 = vld [vmem:[%s6714_s1 + $0x264] ss:$16 sps:$4 sm:$0xff]   ;;  %v4495_v19 = vld [vmem:[%s6714_s1 + $0x260] ss:$16 sps:$4 sm:$0xff]  }
   0xb   :  { %1255 = vmatpush1.bf16.msra.mxu0 %v4482_v10  ;;  %v4496_v20 = vld [vmem:[%s6714_s1 + $0x44] ss:$16 sps:$4 sm:$0xff]   ;;  %v4500_v22 = vld [vmem:[%s6714_s1 + $0x40] ss:$16 sps:$4 sm:$0xff]  }
   0xc   :  { %1296 = vmatpush1.bf16.msra.mxu1 %v4483_v11  ;;  %1256 = vmatprep.subr.bf16.mxu0 %v4484_v12  ;;  %v4498_v21 = vld [vmem:[%s6714_s1 + $0x244] ss:$16 sps:$4 sm:$0xff]   ;;  %v4501_v23 = vld [vmem:[%s6714_s1 + $0x240] ss:$16 sps:$4 sm:$0xff]  }
   0xd   :  { %1297 = vmatprep.subr.bf16.mxu1 %v4486_v13  ;;  %v4502_v24 = vld [vmem:[%s6714_s1 + $0x24] ss:$16 sps:$4 sm:$0xff]   ;;  %v4506_v26 = vld [vmem:[%s6714_s1 + $0x20] ss:$16 sps:$4 sm:$0xff]   ;;  %v4573_v13 = vld [vmem:[%s6714_s1 + $0xec] ss:$16 sps:$4 sm:$0xff]  }
   0xe   :  { %v4504_v25 = vld [vmem:[%s6714_s1 + $0x224] ss:$16 sps:$4 sm:$0xff]   ;;  %v4507_v27 = vld [vmem:[%s6714_s1 + $0x220] ss:$16 sps:$4 sm:$0xff]  }
   0xf   :  { %1257 = vmatpush1.bf16.msra.mxu0 %v4488_v14  ;;  %v4508_v28 = vld [vmem:[%s6714_s1 + $0x4] ss:$16 sps:$4 sm:$0xff]   ;;  %v4512_v30 = vld [vmem:[%s6714_s1] ss:$16 sps:$4 sm:$0xff]  }
  0x10   :  { %1298 = vmatpush1.bf16.msra.mxu1 %v4489_v15  ;;  %1258 = vmatprep.subr.bf16.mxu0 %v4490_v16  ;;  %v4510_v29 = vld [vmem:[%s6714_s1 + $0x204] ss:$16 sps:$4 sm:$0xff]   ;;  %v4513_v31 = vld [vmem:[%s6714_s1 + $0x200] ss:$16 sps:$4 sm:$0xff]   ;;  %v5166_v16 = vmov 0  }
  0x11   :  { %1299 = vmatprep.subr.bf16.mxu1 %v4492_v17  ;;  %v4514_v32 = vld [vmem:[%s6714_s1 + $0x1e4] ss:$16 sps:$4 sm:$0xff]   ;;  %v4518_v34 = vld [vmem:[%s6714_s1 + $0x1e0] ss:$16 sps:$4 sm:$0xff]  }
  0x12   :  { %v4516_v33 = vld [vmem:[%s6714_s1 + $0x3e4] ss:$16 sps:$4 sm:$0xff]   ;;  %v4519_v35 = vld [vmem:[%s6714_s1 + $0x3e0] ss:$16 sps:$4 sm:$0xff]  }
  0x13   :  { %1259 = vmatpush1.bf16.msra.mxu0 %v4494_v18  ;;  %v4520_v36 = vld [vmem:[%s6714_s1 + $0x1c4] ss:$16 sps:$4 sm:$0xff]   ;;  %v4524_v38 = vld [vmem:[%s6714_s1 + $0x1c0] ss:$16 sps:$4 sm:$0xff]   ;;  %v4571_v18 = vld [vmem:[%s6714_s1 + $0xe8] ss:$16 sps:$4 sm:$0xff]  }
  0x14   :  { %1300 = vmatpush1.bf16.msra.mxu1 %v4495_v19  ;;  %1260 = vmatprep.subr.bf16.mxu0 %v4496_v20  ;;  %v4522_v37 = vld [vmem:[%s6714_s1 + $0x3c4] ss:$16 sps:$4 sm:$0xff]   ;;  %v4525_v39 = vld [vmem:[%s6714_s1 + $0x3c0] ss:$16 sps:$4 sm:$0xff]  }
  0x15   :  { %1301 = vmatprep.subr.bf16.mxu1 %v4498_v21  ;;  %v4526_v40 = vld [vmem:[%s6714_s1 + $0x1a4] ss:$16 sps:$4 sm:$0xff]   ;;  %v4530_v42 = vld [vmem:[%s6714_s1 + $0x1a0] ss:$16 sps:$4 sm:$0xff]   ;;  %v4579_v21 = vld [vmem:[%s6714_s1 + $0xcc] ss:$16 sps:$4 sm:$0xff]  }
  0x16   :  { %v4528_v41 = vld [vmem:[%s6714_s1 + $0x3a4] ss:$16 sps:$4 sm:$0xff]   ;;  %v4531_v43 = vld [vmem:[%s6714_s1 + $0x3a0] ss:$16 sps:$4 sm:$0xff]  }
  0x17   :  { %1261 = vmatpush1.bf16.msra.mxu0 %v4500_v22  ;;  %v4532_v44 = vld [vmem:[%s6714_s1 + $0x184] ss:$16 sps:$4 sm:$0xff]   ;;  %v4536_v47 = vld [vmem:[%s6714_s1 + $0x180] ss:$16 sps:$4 sm:$0xff]  }
  0x18   :  { %1302 = vmatpush1.bf16.msra.mxu1 %v4501_v23  ;;  %1262 = vmatprep.subr.bf16.mxu0 %v4502_v24  ;;  %v4534_v45 = vld [vmem:[%s6714_s1 + $0x384] ss:$16 sps:$4 sm:$0xff]   ;;  %v4537_v48 = vld [vmem:[%s6714_s1 + $0x380] ss:$16 sps:$4 sm:$0xff]   ;;  %v4577_v23 = vld [vmem:[%s6714_s1 + $0xc8] ss:$16 sps:$4 sm:$0xff]  }
  0x19   :  { %1303 = vmatprep.subr.bf16.mxu1 %v4504_v25  ;;  %v4538_v51 = vld [vmem:[%s6714_s1 + $0x164] ss:$16 sps:$4 sm:$0xff]   ;;  %v4542_v54 = vld [vmem:[%s6714_s1 + $0x160] ss:$16 sps:$4 sm:$0xff]   ;;  %v4585_v25 = vld [vmem:[%s6714_s1 + $0xac] ss:$16 sps:$4 sm:$0xff]  }
  0x1a   :  { %v4540_v53 = vld [vmem:[%s6714_s1 + $0x364] ss:$16 sps:$4 sm:$0xff]   ;;  %v4543_v55 = vld [vmem:[%s6714_s1 + $0x360] ss:$16 sps:$4 sm:$0xff]  }
  0x1b   :  { %1263 = vmatpush1.bf16.msra.mxu0 %v4506_v26  ;;  %v4544_v56 = vld [vmem:[%s6714_s1 + $0x144] ss:$16 sps:$4 sm:$0xff]   ;;  %v4548_v58 = vld [vmem:[%s6714_s1 + $0x140] ss:$16 sps:$4 sm:$0xff]  }
  0x1c   :  { %1304 = vmatpush1.bf16.msra.mxu1 %v4507_v27  ;;  %1264 = vmatprep.subr.bf16.mxu0 %v4508_v28  ;;  %v4546_v57 = vld [vmem:[%s6714_s1 + $0x344] ss:$16 sps:$4 sm:$0xff]   ;;  %v4549_v59 = vld [vmem:[%s6714_s1 + $0x340] ss:$16 sps:$4 sm:$0xff]   ;;  %v4583_v27 = vld [vmem:[%s6714_s1 + $0xa8] ss:$16 sps:$4 sm:$0xff]  }
  0x1d   :  { %1305 = vmatprep.subr.bf16.mxu1 %v4510_v29  ;;  %v4550_v60 = vld [vmem:[%s6714_s1 + $0x124] ss:$16 sps:$4 sm:$0xff]   ;;  %v4554_v62 = vld [vmem:[%s6714_s1 + $0x120] ss:$16 sps:$4 sm:$0xff]   ;;  %v4591_v29 = vld [vmem:[%s6714_s1 + $0x8c] ss:$16 sps:$4 sm:$0xff]  }
  0x1e   :  { %v4552_v61 = vld [vmem:[%s6714_s1 + $0x324] ss:$16 sps:$4 sm:$0xff]   ;;  %v4555_v63 = vld [vmem:[%s6714_s1 + $0x320] ss:$16 sps:$4 sm:$0xff]  }
  0x1f   :  { %1265 = vmatpush1.bf16.msra.mxu0 %v4512_v30  ;;  %v4556_v0 = vld [vmem:[%s6714_s1 + $0x104] ss:$16 sps:$4 sm:$0xff]   ;;  %v4560_v2 = vld [vmem:[%s6714_s1 + $0x100] ss:$16 sps:$4 sm:$0xff]  }
  0x20   :  { %1306 = vmatpush1.bf16.msra.mxu1 %v4513_v31  ;;  %1266 = vmatprep.subr.bf16.mxu0 %v4514_v32  ;;  %v4558_v1 = vld [vmem:[%s6714_s1 + $0x304] ss:$16 sps:$4 sm:$0xff]   ;;  %v4561_v3 = vld [vmem:[%s6714_s1 + $0x300] ss:$16 sps:$4 sm:$0xff]   ;;  %v4589_v31 = vld [vmem:[%s6714_s1 + $0x88] ss:$16 sps:$4 sm:$0xff]  }
  0x21   :  { %1307 = vmatprep.subr.bf16.mxu1 %v4516_v33  ;;  %v34_v4 = vld [vmem:[%s6713_s0] sm:$0xff]  ;;  %v36_v5 = vld [vmem:[%s6713_s0 + $0x10] sm:$0xff]  ;;  %v4597_v33 = vld [vmem:[%s6714_s1 + $0x6c] ss:$16 sps:$4 sm:$0xff]  }
  0x22   :  { %v4564_v6 = vld [vmem:[%s6714_s1 + $0x4e4] ss:$16 sps:$4 sm:$0xff]   ;;  %v5434_v8 = vpack.c.bf16 %v34_v4, %v34_v4  ;;  %v5436_v9 = vpack.c.bf16 %v36_v5, %v36_v5  ;;  %v4562_v10 = vld [vmem:[%s6714_s1 + $0x4e0] ss:$16 sps:$4 sm:$0xff]   ;;  %v4645_v4 = vld [vmem:[%s6714_s1 + $0x16c] ss:$16 sps:$4 sm:$0xff]  }
  0x23   :  { %1267 = vmatpush2.bf16.msra.mxu0 %v4518_v34  ;;  %v4567_v7 = vld [vmem:[%s6714_s1 + $0x604] ss:$16 sps:$4 sm:$0xff]   ;;  %v4565_v11 = vld [vmem:[%s6714_s1 + $0x600] ss:$16 sps:$4 sm:$0xff]  }
  0x24   :  { %1308 = vmatpush2.bf16.msra.mxu1 %v4519_v35  ;;  %1268 = vmatprep.subr.bf16.mxu0 %v4520_v36  ;;  %v4570_v12 = vld [vmem:[%s6714_s1 + $0x4c4] ss:$16 sps:$4 sm:$0xff]   ;;  %v4568_v14 = vld [vmem:[%s6714_s1 + $0x4c0] ss:$16 sps:$4 sm:$0xff]   ;;  %v39_v35 = vld [vmem:[%s6713_s0 + $0x28] sm:$0xff] }
  0x25   :  { %1309 = vmatprep.subr.bf16.mxu1 %v4522_v37  ;;  %v40_v15 = vld [vmem:[%s6713_s0 + $0x30] sm:$0xff]  ;;  %v5518_v36 = vpack.c.bf16 %v39_v35, %v39_v35  ;;  %v4595_v37 = vld [vmem:[%s6714_s1 + $0x68] ss:$16 sps:$4 sm:$0xff]  }
  0x26   :  { %v4576_v17 = vld [vmem:[%s6714_s1 + $0x4a4] ss:$16 sps:$4 sm:$0xff]   ;;  %v5465_v19 = vpack.c.bf16 %v40_v15, %v40_v15  ;;  %v4574_v20 = vld [vmem:[%s6714_s1 + $0x4a0] ss:$16 sps:$4 sm:$0xff]   ;;  %v4679_v35 = vld [vmem:[%s6714_s1 + $0x4a8] ss:$16 sps:$4 sm:$0xff]  }
  0x27   :  { %1269 = vmatpush2.bf16.msra.mxu0 %v4524_v38  ;;  %v4582_v22 = vld [vmem:[%s6714_s1 + $0x484] ss:$16 sps:$4 sm:$0xff]   ;;  %v4580_v24 = vld [vmem:[%s6714_s1 + $0x480] ss:$16 sps:$4 sm:$0xff]  }
  0x28   :  { %1310 = vmatpush2.bf16.msra.mxu1 %v4525_v39  ;;  %1270 = vmatprep.subr.bf16.mxu0 %v4526_v40  ;;  %v4588_v26 = vld [vmem:[%s6714_s1 + $0x464] ss:$16 sps:$4 sm:$0xff]   ;;  %v4586_v28 = vld [vmem:[%s6714_s1 + $0x460] ss:$16 sps:$4 sm:$0xff]   ;;  %v4603_v39 = vld [vmem:[%s6714_s1 + $0x4c] ss:$16 sps:$4 sm:$0xff]  }
  0x29   :  { %1311 = vmatprep.subr.bf16.mxu1 %v4528_v41  ;;  %v4594_v30 = vld [vmem:[%s6714_s1 + $0x444] ss:$16 sps:$4 sm:$0xff]   ;;  %v4592_v32 = vld [vmem:[%s6714_s1 + $0x440] ss:$16 sps:$4 sm:$0xff]   ;;  %v4601_v41 = vld [vmem:[%s6714_s1 + $0x48] ss:$16 sps:$4 sm:$0xff]  }
  0x2a   :  { %v4600_v34 = vld [vmem:[%s6714_s1 + $0x424] ss:$16 sps:$4 sm:$0xff]   ;;  %v4598_v38 = vld [vmem:[%s6714_s1 + $0x420] ss:$16 sps:$4 sm:$0xff]  }
  0x2b   :  { %1271 = vmatpush2.bf16.msra.mxu0 %v4530_v42  ;;  %v4606_v40 = vld [vmem:[%s6714_s1 + $0x404] ss:$16 sps:$4 sm:$0xff]   ;;  %v4604_v42 = vld [vmem:[%s6714_s1 + $0x400] ss:$16 sps:$4 sm:$0xff]  }
  0x2c   :  { %1312 = vmatpush2.bf16.msra.mxu1 %v4531_v43  ;;  %1272 = vmatprep.subr.bf16.mxu0 %v4532_v44  ;;  %v4609_v43 = vld [vmem:[%s6714_s1 + $0x2c] ss:$16 sps:$4 sm:$0xff]   ;;  %v4612_v44 = vld [vmem:[%s6714_s1 + $0x5e4] ss:$16 sps:$4 sm:$0xff]   ;;  %v4610_v46 = vld [vmem:[%s6714_s1 + $0x5e0] ss:$16 sps:$4 sm:$0xff]  }
  0x2d   :  { %1313 = vmatprep.subr.bf16.mxu1 %v4534_v45  ;;  %v4607_v45 = vld [vmem:[%s6714_s1 + $0x28] ss:$16 sps:$4 sm:$0xff]   ;;  %v4616_v50 = vld [vmem:[%s6714_s1 + $0x5c0] ss:$16 sps:$4 sm:$0xff]   ;;  %v4648_v5 = vld [vmem:[%s6714_s1 + $0x524] ss:$16 sps:$4 sm:$0xff]  }
  0x2e   :  { %v38_v15 = vld [vmem:[%s6713_s0 + $0x20] sm:$0xff] }
  0x2f   :  { %1273 = vmatpush2.bf16.msra.mxu0 %v4536_v47  ;;  %v4615_v47 = vld [vmem:[%s6714_s1 + $0xc] ss:$16 sps:$4 sm:$0xff]  }
  0x30   :  { %1314 = vmatpush2.bf16.msra.mxu1 %v4537_v48  ;;  %1274 = vmatprep.subr.bf16.mxu0 %v4538_v51  ;;  %v4618_v48 = vld [vmem:[%s6714_s1 + $0x5c4] ss:$16 sps:$4 sm:$0xff]   ;;  %v4621_v51 = vld [vmem:[%s6714_s1 + $0x1ec] ss:$16 sps:$4 sm:$0xff]  }
  0x31   :  { %1315 = vmatprep.subr.bf16.mxu1 %v4540_v53  ;;  %v4624_v53 = vld [vmem:[%s6714_s1 + $0x5a4] ss:$16 sps:$4 sm:$0xff]  }
  0x33   :  { %1275 = vmatpush2.bf16.msra.mxu0 %v4542_v54  ;;  %v4619_v54 = vld [vmem:[%s6714_s1 + $0x1e8] ss:$16 sps:$4 sm:$0xff]  }
  0x34   :  { %1316 = vmatpush2.bf16.msra.mxu1 %v4543_v55  ;;  %1276 = vmatprep.subr.bf16.mxu0 %v4544_v56  ;;  %v4622_v55 = vld [vmem:[%s6714_s1 + $0x5a0] ss:$16 sps:$4 sm:$0xff]   ;;  %v4627_v56 = vld [vmem:[%s6714_s1 + $0x1cc] ss:$16 sps:$4 sm:$0xff]  }
  0x35   :  { %1317 = vmatprep.subr.bf16.mxu1 %v4546_v57  ;;  %v4630_v57 = vld [vmem:[%s6714_s1 + $0x584] ss:$16 sps:$4 sm:$0xff]  }
  0x37   :  { %1277 = vmatpush2.bf16.msra.mxu0 %v4548_v58  ;;  %v4625_v58 = vld [vmem:[%s6714_s1 + $0x1c8] ss:$16 sps:$4 sm:$0xff]  }
  0x38   :  { %1318 = vmatpush2.bf16.msra.mxu1 %v4549_v59  ;;  %1278 = vmatprep.subr.bf16.mxu0 %v4550_v60  ;;  %v4628_v59 = vld [vmem:[%s6714_s1 + $0x580] ss:$16 sps:$4 sm:$0xff]   ;;  %v4633_v60 = vld [vmem:[%s6714_s1 + $0x1ac] ss:$16 sps:$4 sm:$0xff]  }
  0x39   :  { %1319 = vmatprep.subr.bf16.mxu1 %v4552_v61  ;;  %v4636_v61 = vld [vmem:[%s6714_s1 + $0x564] ss:$16 sps:$4 sm:$0xff]  }
  0x3b   :  { %1279 = vmatpush2.bf16.msra.mxu0 %v4554_v62  ;;  %v4631_v62 = vld [vmem:[%s6714_s1 + $0x1a8] ss:$16 sps:$4 sm:$0xff]  }
  0x3c   :  { %1320 = vmatpush2.bf16.msra.mxu1 %v4555_v63  ;;  %1280 = vmatprep.subr.bf16.mxu0 %v4556_v0  ;;  %v4634_v63 = vld [vmem:[%s6714_s1 + $0x560] ss:$16 sps:$4 sm:$0xff]   ;;  %v4639_v0 = vld [vmem:[%s6714_s1 + $0x18c] ss:$16 sps:$4 sm:$0xff]  }
  0x3d   :  { %1321 = vmatprep.subr.bf16.mxu1 %v4558_v1  ;;  %v4642_v1 = vld [vmem:[%s6714_s1 + $0x544] ss:$16 sps:$4 sm:$0xff]  }
  0x3f   :  { %1281 = vmatpush2.bf16.msra.mxu0 %v4560_v2  ;;  %v4637_v2 = vld [vmem:[%s6714_s1 + $0x188] ss:$16 sps:$4 sm:$0xff]  }
  0x40   :  { %1322 = vmatpush2.bf16.msra.mxu1 %v4561_v3  ;;  %1332 = vmatprep.subr.bf16.mxu0 %v4564_v6  ;;  %v4640_v3 = vld [vmem:[%s6714_s1 + $0x540] ss:$16 sps:$4 sm:$0xff]   ;;  %v4643_v6 = vld [vmem:[%s6714_s1 + $0x168] ss:$16 sps:$4 sm:$0xff]  }
  0x41   :  { %1387 = vmatprep.subr.bf16.mxu1 %v4567_v7  ;;  %v4646_v7 = vld [vmem:[%s6714_s1 + $0x520] ss:$16 sps:$4 sm:$0xff]  }
  0x42   :  { %1283 = vmatmul.mubr.bf16.vlgmr.msra.gmra.mxu0 %v5434_v8 }
  0x43   :  { %1324 = vmatmul.mubr.bf16.vlgmr.msra.gmra.mxu1 %v5436_v9  ;;  %1333 = vmatpush1.bf16.msra.mxu0 %v4562_v10  ;;  %v4651_v10 = vld [vmem:[%s6714_s1 + $0x14c] ss:$16 sps:$4 sm:$0xff]  }
  0x44   :  { %1388 = vmatpush1.bf16.msra.mxu1 %v4565_v11  ;;  %1334 = vmatprep.subr.bf16.mxu0 %v4570_v12  ;;  %v4654_v11 = vld [vmem:[%s6714_s1 + $0x504] ss:$16 sps:$4 sm:$0xff]   ;;  %v4649_v12 = vld [vmem:[%s6714_s1 + $0x148] ss:$16 sps:$4 sm:$0xff]  }
  0x45   :  { %1405 = vmatprep.mubr.bf16.mxu1 %v5166_v16  ;;  %1414 = vmatprep.subr.bf16.mxu1 %v4573_v13  ;;  %v4652_v13 = vld [vmem:[%s6714_s1 + $0x500] ss:$16 sps:$4 sm:$0xff]  }
  0x46   :  { %1364 = vmatprep.mubr.bf16.mxu0 %v5518_v36 }
  0x47   :  { %1335 = vmatpush1.bf16.msra.mxu0 %v4568_v14  ;;  %v4657_v14 = vld [vmem:[%s6714_s1 + $0x12c] ss:$16 sps:$4 sm:$0xff]  }
  0x48   :  { %1336 = vmatprep.subr.bf16.mxu0 %v4576_v17  ;;  %v4660_v17 = vld [vmem:[%s6714_s1 + $0x2ec] ss:$16 sps:$4 sm:$0xff]  }
  0x4b   :  { %4102 = vmatmul.mubr.msk.bf16.vlgmr.msra.gmra.mxu1 %vm1246_vm0, %v5465_v19  ;;  %1337 = vmatpush1.bf16.msra.mxu0 %v4574_v20  ;;  %v5647_v20 = vpack.c.bf16 %v38_v15, %v38_v15  ;;  %v4747_v15 = vld [vmem:[%s6714_s1 + $0x54c] ss:$16 sps:$4 sm:$0xff]  }
  0x4c   :  { %1415 = vmatpush1.bf16.msra.mxu1 %v4571_v18  ;;  %1338 = vmatprep.subr.bf16.mxu0 %v4582_v22  ;;  %v4655_v18 = vld [vmem:[%s6714_s1 + $0x128] ss:$16 sps:$4 sm:$0xff]   ;;  %v4663_v22 = vld [vmem:[%s6714_s1 + $0x10c] ss:$16 sps:$4 sm:$0xff]  }
  0x4d   :  { %1416 = vmatprep.subr.bf16.mxu1 %v4579_v21  ;;  %1446 = vmatprep.mubr.bf16.mxu1 %v5365_v49  ;;  %v4613_v49 = vld [vmem:[%s6714_s1 + $0x8] ss:$16 sps:$4 sm:$0xff]  }
  0x4e   :  { %v4658_v21 = vld [vmem:[%s6714_s1 + $0x2e8] ss:$16 sps:$4 sm:$0xff]  }
  0x4f   :  { %1339 = vmatpush1.bf16.msra.mxu0 %v4580_v24  ;;  %v4661_v24 = vld [vmem:[%s6714_s1 + $0x108] ss:$16 sps:$4 sm:$0xff]  }
  0x50   :  { %1417 = vmatpush1.bf16.msra.mxu1 %v4577_v23  ;;  %1340 = vmatprep.subr.bf16.mxu0 %v4588_v26  ;;  %v4666_v23 = vld [vmem:[%s6714_s1 + $0x2cc] ss:$16 sps:$4 sm:$0xff]  }
  0x51   :  { %1418 = vmatprep.subr.bf16.mxu1 %v4585_v25  ;;  %v4664_v25 = vld [vmem:[%s6714_s1 + $0x2c8] ss:$16 sps:$4 sm:$0xff]   ;;  %v4669_v26 = vld [vmem:[%s6714_s1 + $0x4ec] ss:$16 sps:$4 sm:$0xff]  }
  0x53   :  { %1341 = vmatpush1.bf16.msra.mxu0 %v4586_v28  ;;  %v4667_v28 = vld [vmem:[%s6714_s1 + $0x4e8] ss:$16 sps:$4 sm:$0xff]  }
  0x54   :  { %1419 = vmatpush1.bf16.msra.mxu1 %v4583_v27  ;;  %1342 = vmatprep.subr.bf16.mxu0 %v4594_v30  ;;  %v4672_v27 = vld [vmem:[%s6714_s1 + $0x2ac] ss:$16 sps:$4 sm:$0xff]  }
  0x55   :  { %1420 = vmatprep.subr.bf16.mxu1 %v4591_v29  ;;  %v4670_v29 = vld [vmem:[%s6714_s1 + $0x2a8] ss:$16 sps:$4 sm:$0xff]   ;;  %v4675_v30 = vld [vmem:[%s6714_s1 + $0x4cc] ss:$16 sps:$4 sm:$0xff]  }
  0x57   :  { %1343 = vmatpush1.bf16.msra.mxu0 %v4592_v32  ;;  %v4673_v32 = vld [vmem:[%s6714_s1 + $0x4c8] ss:$16 sps:$4 sm:$0xff]  }
  0x58   :  { %1421 = vmatpush1.bf16.msra.mxu1 %v4589_v31  ;;  %1344 = vmatprep.subr.bf16.mxu0 %v4600_v34  ;;  %v4678_v31 = vld [vmem:[%s6714_s1 + $0x28c] ss:$16 sps:$4 sm:$0xff]  }
  0x59   :  { %1422 = vmatprep.subr.bf16.mxu1 %v4597_v33  ;;  %v4681_v33 = vld [vmem:[%s6714_s1 + $0x4ac] ss:$16 sps:$4 sm:$0xff]  }
  0x5a   :  { %v4684_v34 = vld [vmem:[%s6714_s1 + $0x26c] ss:$16 sps:$4 sm:$0xff]  }
  0x5b   :  { %1345 = vmatpush1.bf16.msra.mxu0 %v4598_v38  ;;  %v4690_v38 = vld [vmem:[%s6714_s1 + $0x24c] ss:$16 sps:$4 sm:$0xff]  }
  0x5c   :  { %1423 = vmatpush1.bf16.msra.mxu1 %v4595_v37  ;;  %1346 = vmatprep.subr.bf16.mxu0 %v4606_v40  ;;  %v4687_v37 = vld [vmem:[%s6714_s1 + $0x48c] ss:$16 sps:$4 sm:$0xff]  }
  0x5d   :  { %1424 = vmatprep.subr.bf16.mxu1 %v4603_v39  ;;  %v4685_v39 = vld [vmem:[%s6714_s1 + $0x488] ss:$16 sps:$4 sm:$0xff]   ;;  %v4693_v40 = vld [vmem:[%s6714_s1 + $0x46c] ss:$16 sps:$4 sm:$0xff]  }
  0x5f   :  { %1347 = vmatpush1.bf16.msra.mxu0 %v4604_v42  ;;  %v4691_v42 = vld [vmem:[%s6714_s1 + $0x468] ss:$16 sps:$4 sm:$0xff]  }
  0x60   :  { %1425 = vmatpush1.bf16.msra.mxu1 %v4601_v41  ;;  %1348 = vmatprep.subr.bf16.mxu0 %v4612_v44  ;;  %v4696_v41 = vld [vmem:[%s6714_s1 + $0x22c] ss:$16 sps:$4 sm:$0xff]  }
  0x61   :  { %1426 = vmatprep.subr.bf16.mxu1 %v4609_v43  ;;  %v4694_v43 = vld [vmem:[%s6714_s1 + $0x228] ss:$16 sps:$4 sm:$0xff]   ;;  %v4699_v44 = vld [vmem:[%s6714_s1 + $0x44c] ss:$16 sps:$4 sm:$0xff]  }
  0x63   :  { %1349 = vmatpush2.bf16.msra.mxu0 %v4610_v46  ;;  %v4697_v46 = vld [vmem:[%s6714_s1 + $0x448] ss:$16 sps:$4 sm:$0xff]  }
  0x64   :  { %1427 = vmatpush1.bf16.msra.mxu1 %v4607_v45  ;;  %1350 = vmatprep.subr.bf16.mxu0 %v4618_v48  ;;  %v4702_v45 = vld [vmem:[%s6714_s1 + $0x20c] ss:$16 sps:$4 sm:$0xff]  }
  0x65   :  { %1428 = vmatprep.subr.bf16.mxu1 %v4615_v47  ;;  %v4700_v47 = vld [vmem:[%s6714_s1 + $0x208] ss:$16 sps:$4 sm:$0xff]   ;;  %v4705_v48 = vld [vmem:[%s6714_s1 + $0x42c] ss:$16 sps:$4 sm:$0xff]  }
  0x67   :  { %1351 = vmatpush2.bf16.msra.mxu0 %v4616_v50  ;;  %v4703_v50 = vld [vmem:[%s6714_s1 + $0x428] ss:$16 sps:$4 sm:$0xff]  }
  0x68   :  { %1429 = vmatpush1.bf16.msra.mxu1 %v4613_v49  ;;  %1352 = vmatprep.subr.bf16.mxu0 %v4624_v53  ;;  %v4708_v49 = vld [vmem:[%s6714_s1 + $0x3ec] ss:$16 sps:$4 sm:$0xff]  }
  0x69   :  { %1430 = vmatprep.subr.bf16.mxu1 %v4621_v51  ;;  %v4706_v51 = vld [vmem:[%s6714_s1 + $0x3e8] ss:$16 sps:$4 sm:$0xff]   ;;  %v4711_v53 = vld [vmem:[%s6714_s1 + $0x40c] ss:$16 sps:$4 sm:$0xff]  }
  0x6b   :  { %1353 = vmatpush2.bf16.msra.mxu0 %v4622_v55  ;;  %v4709_v55 = vld [vmem:[%s6714_s1 + $0x408] ss:$16 sps:$4 sm:$0xff]  }
  0x6c   :  { %1431 = vmatpush2.bf16.msra.mxu1 %v4619_v54  ;;  %1354 = vmatprep.subr.bf16.mxu0 %v4630_v57  ;;  %v4714_v54 = vld [vmem:[%s6714_s1 + $0x3cc] ss:$16 sps:$4 sm:$0xff]  }
  0x6d   :  { %1432 = vmatprep.subr.bf16.mxu1 %v4627_v56  ;;  %v4712_v56 = vld [vmem:[%s6714_s1 + $0x3c8] ss:$16 sps:$4 sm:$0xff]   ;;  %v4717_v57 = vld [vmem:[%s6714_s1 + $0x5ec] ss:$16 sps:$4 sm:$0xff]  }
  0x6f   :  { %1355 = vmatpush2.bf16.msra.mxu0 %v4628_v59  ;;  %v4715_v59 = vld [vmem:[%s6714_s1 + $0x5e8] ss:$16 sps:$4 sm:$0xff]  }
  0x70   :  { %1433 = vmatpush2.bf16.msra.mxu1 %v4625_v58  ;;  %1356 = vmatprep.subr.bf16.mxu0 %v4636_v61  ;;  %v4720_v58 = vld [vmem:[%s6714_s1 + $0x3ac] ss:$16 sps:$4 sm:$0xff]  }
  0x71   :  { %1434 = vmatprep.subr.bf16.mxu1 %v4633_v60  ;;  %v4718_v60 = vld [vmem:[%s6714_s1 + $0x3a8] ss:$16 sps:$4 sm:$0xff]   ;;  %v4723_v61 = vld [vmem:[%s6714_s1 + $0x5cc] ss:$16 sps:$4 sm:$0xff]  }
  0x73   :  { %1357 = vmatpush2.bf16.msra.mxu0 %v4634_v63  ;;  %v4721_v63 = vld [vmem:[%s6714_s1 + $0x5c8] ss:$16 sps:$4 sm:$0xff]  }
  0x74   :  { %1435 = vmatpush2.bf16.msra.mxu1 %v4631_v62  ;;  %1358 = vmatprep.subr.bf16.mxu0 %v4642_v1  ;;  %v4726_v62 = vld [vmem:[%s6714_s1 + $0x38c] ss:$16 sps:$4 sm:$0xff]  }
  0x75   :  { %1436 = vmatprep.subr.bf16.mxu1 %v4639_v0  ;;  %v4724_v0 = vld [vmem:[%s6714_s1 + $0x388] ss:$16 sps:$4 sm:$0xff]   ;;  %v4729_v1 = vld [vmem:[%s6714_s1 + $0x5ac] ss:$16 sps:$4 sm:$0xff]  }
  0x77   :  { %1359 = vmatpush2.bf16.msra.mxu0 %v4640_v3  ;;  %v4727_v3 = vld [vmem:[%s6714_s1 + $0x5a8] ss:$16 sps:$4 sm:$0xff]  }
  0x78   :  { %1437 = vmatpush2.bf16.msra.mxu1 %v4637_v2  ;;  %1360 = vmatprep.subr.bf16.mxu0 %v4648_v5  ;;  %v4732_v2 = vld [vmem:[%s6714_s1 + $0x36c] ss:$16 sps:$4 sm:$0xff]  }
  0x79   :  { %1438 = vmatprep.subr.bf16.mxu1 %v4645_v4  ;;  %v4730_v4 = vld [vmem:[%s6714_s1 + $0x368] ss:$16 sps:$4 sm:$0xff]   ;;  %v4735_v5 = vld [vmem:[%s6714_s1 + $0x58c] ss:$16 sps:$4 sm:$0xff]  }
  0x7b   :  { %1361 = vmatpush2.bf16.msra.mxu0 %v4646_v7  ;;  %v4733_v7 = vld [vmem:[%s6714_s1 + $0x588] ss:$16 sps:$4 sm:$0xff]  }
  0x7c   :  { %1439 = vmatpush2.bf16.msra.mxu1 %v4643_v6  ;;  %1362 = vmatprep.subr.bf16.mxu0 %v4654_v11  ;;  %v4738_v6 = vld [vmem:[%s6714_s1 + $0x34c] ss:$16 sps:$4 sm:$0xff]  }
  0x7d   :  { %1440 = vmatprep.subr.bf16.mxu1 %v4651_v10  ;;  %v4736_v10 = vld [vmem:[%s6714_s1 + $0x348] ss:$16 sps:$4 sm:$0xff]   ;;  %v4741_v11 = vld [vmem:[%s6714_s1 + $0x56c] ss:$16 sps:$4 sm:$0xff]  }
  0x7f   :  { %1363 = vmatpush2.bf16.msra.mxu0 %v4652_v13  ;;  %v4739_v13 = vld [vmem:[%s6714_s1 + $0x568] ss:$16 sps:$4 sm:$0xff]  }
  0x80   :  { %1441 = vmatpush2.bf16.msra.mxu1 %v4649_v12  ;;  %1455 = vmatprep.subr.bf16.mxu0 %v4660_v17  ;;  %v4744_v12 = vld [vmem:[%s6714_s1 + $0x32c] ss:$16 sps:$4 sm:$0xff]  }
  0x81   :  { %1442 = vmatprep.subr.bf16.mxu1 %v4657_v14  ;;  %v4742_v14 = vld [vmem:[%s6714_s1 + $0x328] ss:$16 sps:$4 sm:$0xff]   ;;  %v4750_v17 = vld [vmem:[%s6714_s1 + $0x30c] ss:$16 sps:$4 sm:$0xff]  }
  0x82   :  { %1365 = vmatmul.mubr.bf16.vlgmr.msra.gmra.mxu0 %v5647_v20 }
  0x83   :  { %1456 = vmatpush1.bf16.msra.mxu0 %v4658_v21  ;;  %1487 = vmatprep.mubr.bf16.mxu0 %v5373_v52  ;;  %v4676_v52 = vld [vmem:[%s6714_s1 + $0x288] ss:$16 sps:$4 sm:$0xff]  }
  0x84   :  { %1443 = vmatpush2.bf16.msra.mxu1 %v4655_v18  ;;  %1457 = vmatprep.subr.bf16.mxu0 %v4666_v23  ;;  %v4745_v18 = vld [vmem:[%s6714_s1 + $0x548] ss:$16 sps:$4 sm:$0xff]   ;;  %v4756_v23 = vld [vmem:[%s6714_s1 + $0x60c] ss:$16 sps:$4 sm:$0xff]  }
  0x85   :  { %1444 = vmatprep.subr.bf16.mxu1 %v4663_v22  ;;  %v4748_v21 = vld [vmem:[%s6714_s1 + $0x308] ss:$16 sps:$4 sm:$0xff]   ;;  %v4753_v22 = vld [vmem:[%s6714_s1 + $0x52c] ss:$16 sps:$4 sm:$0xff]  }
  0x87   :  { %1458 = vmatpush1.bf16.msra.mxu0 %v4664_v25  ;;  %v4754_v25 = vld [vmem:[%s6714_s1 + $0x608] ss:$16 sps:$4 sm:$0xff]  }
  0x88   :  { %1445 = vmatpush2.bf16.msra.mxu1 %v4661_v24  ;;  %1459 = vmatprep.subr.bf16.mxu0 %v4672_v27  ;;  %v4751_v24 = vld [vmem:[%s6714_s1 + $0x528] ss:$16 sps:$4 sm:$0xff]  }
  0x89   :  { %1496 = vmatprep.subr.bf16.mxu1 %v4669_v26  ;;  %v4759_v26 = vld [vmem:[%s6714_s1 + $0x50c] ss:$16 sps:$4 sm:$0xff]  }
  0x8a   :  { %v4760_v27 = vld [vmem:[%s6716_s3 + $0x78] sm:$0xff]  }
  0x8b   :  { %1447 = vmatmul.mubr.bf16.vlgmr.msra.gmra.mxu1 %v5434_v8  ;;  %1460 = vmatpush1.bf16.msra.mxu0 %v4670_v29  ;;  %v4682_v8 = vld [vmem:[%s6714_s1 + $0x268] ss:$16 sps:$4 sm:$0xff]  }
  0x8c   :  { %1497 = vmatpush1.bf16.msra.mxu1 %v4667_v28  ;;  %1461 = vmatprep.subr.bf16.mxu0 %v4678_v31  ;;  %v4757_v28 = vld [vmem:[%s6714_s1 + $0x508] ss:$16 sps:$4 sm:$0xff]  }
  0x8d   :  { %1498 = vmatprep.subr.bf16.mxu1 %v4675_v30  ;;  %1528 = vmatprep.mubr.bf16.mxu1 %v5518_v36  ;;  %v4688_v36 = vld [vmem:[%s6714_s1 + $0x248] ss:$16 sps:$4 sm:$0xff]   ;;  %v4762_v30 = vld [vmem:[%s6716_s3 + $0x70] sm:$0xff]  }
  0x8e   :  { %v4761_v29 = vld [vmem:[%s6716_s3 + $0x38] sm:$0xff]   ;;  %v4764_v31 = vld [vmem:[%s6716_s3 + $0x68] sm:$0xff]  }
  0x8f   :  { %1462 = vmatpush1.bf16.msra.mxu0 %v4676_v52  ;;  %v4766_v52 = vld [vmem:[%s6716_s3 + $0x60] sm:$0xff]  }
  0x90   :  { %1499 = vmatpush1.bf16.msra.mxu1 %v4673_v32  ;;  %1463 = vmatprep.subr.bf16.mxu0 %v4684_v34  ;;  %v4765_v32 = vld [vmem:[%s6716_s3 + $0x28] sm:$0xff]   ;;  %v4767_v34 = vld [vmem:[%s6716_s3 + $0x20] sm:$0xff]  }
  0x91   :  { %1500 = vmatprep.subr.bf16.mxu1 %v4681_v33  ;;  %v4778_v33 = vld [vmem:[%s6716_s3 + $0xf0] sm:$0xff]  }
  0x93   :  { %1464 = vmatpush1.bf16.msra.mxu0 %v4682_v8  ;;  %v4768_v8 = vld [vmem:[%s6716_s3 + $0x58] sm:$0xff]  }
  0x94   :  { %1501 = vmatpush1.bf16.msra.mxu1 %v4679_v35  ;;  %1465 = vmatprep.subr.bf16.mxu0 %v4690_v38  ;;  %v4779_v35 = vld [vmem:[%s6716_s3 + $0xb0] sm:$0xff]   ;;  %v4769_v38 = vld [vmem:[%s6716_s3 + $0x18] sm:$0xff]  }
  0x95   :  { %1502 = vmatprep.subr.bf16.mxu1 %v4687_v37  ;;  %v4780_v37 = vld [vmem:[%s6716_s3 + $0xe8] sm:$0xff]  }
  0x97   :  { %1466 = vmatpush1.bf16.msra.mxu0 %v4688_v36  ;;  %v4770_v36 = vld [vmem:[%s6716_s3 + $0x50] sm:$0xff]  }
  0x98   :  { %1503 = vmatpush1.bf16.msra.mxu1 %v4685_v39  ;;  %1467 = vmatprep.subr.bf16.mxu0 %v4696_v41  ;;  %v4781_v39 = vld [vmem:[%s6716_s3 + $0xa8] sm:$0xff]   ;;  %v4771_v41 = vld [vmem:[%s6716_s3 + $0x10] sm:$0xff]  }
  0x99   :  { %1504 = vmatprep.subr.bf16.mxu1 %v4693_v40  ;;  %v4782_v40 = vld [vmem:[%s6716_s3 + $0xe0] sm:$0xff]  }
  0x9b   :  { %1468 = vmatpush1.bf16.msra.mxu0 %v4694_v43  ;;  %v4773_v43 = vld [vmem:[%s6716_s3 + $0x8] sm:$0xff]  }
  0x9c   :  { %1505 = vmatpush1.bf16.msra.mxu1 %v4691_v42  ;;  %1469 = vmatprep.subr.bf16.mxu0 %v4702_v45  ;;  %v4772_v42 = vld [vmem:[%s6716_s3 + $0x48] sm:$0xff]   ;;  %v4775_v45 = vld [vmem:[%s6716_s3] sm:$0xff]  }
  0x9d   :  { %1506 = vmatprep.subr.bf16.mxu1 %v4699_v44  ;;  %v4774_v44 = vld [vmem:[%s6716_s3 + $0x40] sm:$0xff]  }
  0x9f   :  { %1470 = vmatpush1.bf16.msra.mxu0 %v4700_v47 }
  0xa0   :  { %1507 = vmatpush1.bf16.msra.mxu1 %v4697_v46  ;;  %1471 = vmatprep.subr.bf16.mxu0 %v4708_v49 }
  0xa1   :  { %1508 = vmatprep.subr.bf16.mxu1 %v4705_v48 }
  0xa3   :  { %1472 = vmatpush2.bf16.msra.mxu0 %v4706_v51 }
  0xa4   :  { %1509 = vmatpush1.bf16.msra.mxu1 %v4703_v50  ;;  %1473 = vmatprep.subr.bf16.mxu0 %v4714_v54 }
  0xa5   :  { %1510 = vmatprep.subr.bf16.mxu1 %v4711_v53 }
  0xa7   :  { %1474 = vmatpush2.bf16.msra.mxu0 %v4712_v56 }
  0xa8   :  { %1511 = vmatpush1.bf16.msra.mxu1 %v4709_v55  ;;  %1475 = vmatprep.subr.bf16.mxu0 %v4720_v58 }
  0xa9   :  { %1512 = vmatprep.subr.bf16.mxu1 %v4717_v57 }
  0xab   :  { %1476 = vmatpush2.bf16.msra.mxu0 %v4718_v60 }
  0xac   :  { %1513 = vmatpush2.bf16.msra.mxu1 %v4715_v59  ;;  %1477 = vmatprep.subr.bf16.mxu0 %v4726_v62 }
  0xad   :  { %1514 = vmatprep.subr.bf16.mxu1 %v4723_v61 }
  0xaf   :  { %1478 = vmatpush2.bf16.msra.mxu0 %v4724_v0 }
  0xb0   :  { %1515 = vmatpush2.bf16.msra.mxu1 %v4721_v63  ;;  %1479 = vmatprep.subr.bf16.mxu0 %v4732_v2 }
  0xb1   :  { %1516 = vmatprep.subr.bf16.mxu1 %v4729_v1 }
  0xb3   :  { %1480 = vmatpush2.bf16.msra.mxu0 %v4730_v4 }
  0xb4   :  { %1517 = vmatpush2.bf16.msra.mxu1 %v4727_v3  ;;  %1481 = vmatprep.subr.bf16.mxu0 %v4738_v6 }
  0xb5   :  { %1518 = vmatprep.subr.bf16.mxu1 %v4735_v5 }
  0xb7   :  { %1482 = vmatpush2.bf16.msra.mxu0 %v4736_v10 }
  0xb8   :  { %1519 = vmatpush2.bf16.msra.mxu1 %v4733_v7  ;;  %1483 = vmatprep.subr.bf16.mxu0 %v4744_v12 }
  0xb9   :  { %1520 = vmatprep.subr.bf16.mxu1 %v4741_v11 }
  0xbb   :  { %1484 = vmatpush2.bf16.msra.mxu0 %v4742_v14 }
  0xbc   :  { %1521 = vmatpush2.bf16.msra.mxu1 %v4739_v13  ;;  %1485 = vmatprep.subr.bf16.mxu0 %v4750_v17 }
  0xbd   :  { %1522 = vmatprep.subr.bf16.mxu1 %v4747_v15 }
  0xbf   :  { %1486 = vmatpush2.bf16.msra.mxu0 %v4748_v21 }
  0xc0   :  { %1523 = vmatpush2.bf16.msra.mxu1 %v4745_v18  ;;  %1551 = vmatprep.subr.bf16.mxu0 %v4756_v23 }
  0xc1   :  { %1524 = vmatprep.subr.bf16.mxu1 %v4753_v22 }
  0xc2   :  { %1488 = vmatmul.mubr.bf16.vlgmr.msra.gmra.mxu0 %v5436_v9  ;;  %v4763_v9 = vld [vmem:[%s6716_s3 + $0x30] sm:$0xff]  }
  0xc3   :  { %1552 = vmatpush1.bf16.msra.mxu0 %v4754_v25  ;;  %1569 = vmatprep.mubr.bf16.mxu0 %v5166_v16 }
  0xc4   :  { %1525 = vmatpush2.bf16.msra.mxu1 %v4751_v24  ;;  %4376 = vmatprep.subr.bf16.mxu0 %v4760_v27 }
  0xc5   :  { %1526 = vmatprep.subr.bf16.mxu1 %v4759_v26 }
  0xc8   :  { %1527 = vmatpush2.bf16.msra.mxu1 %v4757_v28 }
  0xca   :  { %4103 = vmatmul.mubr.msk.bf16.vlgmr.msra.gmra.mxu0 %vm1246_vm0, %v5465_v19  ;;  %v4776_v19 = vld [vmem:[%s6716_s3 + $0xf8] sm:$0xff]  }
  0xcb   :  { %1529 = vmatmul.mubr.bf16.vlgmr.msra.gmra.mxu1 %v5647_v20  ;;  %4377 = vmatpush3.bf16.msra.mxu0 %v4761_v29  ;;  %v4777_v20 = vld [vmem:[%s6716_s3 + $0xb8] sm:$0xff]  }
  0xcc   :  { %4378 = vmatprep.subr.bf16.mxu0 %v4762_v30  ;;  %4398 = vmatprep.subr.bf16.mxu1 %v4776_v19 }
  0xcd   :  { %4399 = vmatpush3.bf16.msra.mxu1 %v4777_v20 }
  0xce   :  { %4400 = vmatprep.subr.bf16.mxu1 %v4778_v33 }
  0xcf   :  { %4379 = vmatpush3.bf16.msra.mxu0 %v4763_v9 }
  0xd0   :  { %4380 = vmatprep.subr.bf16.mxu0 %v4764_v31 }
  0xd1   :  { %4401 = vmatpush3.bf16.msra.mxu1 %v4779_v35 }
  0xd2   :  { %4402 = vmatprep.subr.bf16.mxu1 %v4780_v37 }
  0xd3   :  { %4381 = vmatpush3.bf16.msra.mxu0 %v4765_v32 }
  0xd4   :  { %4382 = vmatprep.subr.bf16.mxu0 %v4766_v52 }
  0xd5   :  { %4403 = vmatpush3.bf16.msra.mxu1 %v4781_v39 }
  0xd6   :  { %4404 = vmatprep.subr.bf16.mxu1 %v4782_v40 }
  0xd7   :  { %4383 = vmatpush3.bf16.msra.mxu0 %v4767_v34 }
  0xd8   :  { %4384 = vmatprep.subr.bf16.mxu0 %v4768_v8 }
  0xdb   :  { %4385 = vmatpush3.bf16.msra.mxu0 %v4769_v38 }
  0xdc   :  { %4386 = vmatprep.subr.bf16.mxu0 %v4770_v36 }
  0xdf   :  { %4387 = vmatpush3.bf16.msra.mxu0 %v4771_v41 }
  0xe0   :  { %4388 = vmatprep.subr.bf16.mxu0 %v4772_v42 }
  0xe3   :  { %4389 = vmatpush3.bf16.msra.mxu0 %v4773_v43 }
  0xe4   :  { %4390 = vmatprep.subr.bf16.mxu0 %v4774_v44 }
  0xe7   :  { %4391 = vmatpush3.bf16.msra.mxu0 %v4775_v45 }
  0xe8   :  { %14 = vsyncpa [#allocation3], 0  ;;  %v4783_v46 = vld [vmem:[%s6716_s3 + $0xa0] sm:$0xff]   ;;  %v4784_v51 = vld [vmem:[%s6716_s3 + $0xd8] sm:$0xff]   ;;  %v246_v4 = vlaneseq  ;;  %vm1969_vm1 = vcmask 1043456   ;;  %vm1965_vm2 = vcmask 64512  }
  0xe9   :  { %4405 = vmatpush3.bf16.msra.mxu1 %v4783_v46  ;;  %v4785_v53 = vld [vmem:[%s6716_s3 + $0x98] sm:$0xff]   ;;  %v4786_v58 = vld [vmem:[%s6716_s3 + $0xd0] sm:$0xff]   ;;  %v4788_v62 = vld [vmem:[%s6716_s3 + $0xc8] sm:$0xff]  }
  0xea   :  { %4406 = vmatprep.subr.bf16.mxu1 %v4784_v51  ;;  %v4787_v59 = vld [vmem:[%s6716_s3 + $0x90] sm:$0xff]   ;;  %v4789_v63 = vld [vmem:[%s6716_s3 + $0x88] sm:$0xff]   ;;  %v4790_v2 = vld [vmem:[%s6716_s3 + $0xc0] sm:$0xff]   ;;  %v5955_v5 = vshrl.u32 %v246_v4, 7 }
  0xeb   :  { %v4791_v3 = vld [vmem:[%s6716_s3 + $0x80] sm:$0xff]   ;;  %v4801_v4 = vld [vmem:[%s6720_s7 + $0x50c] ss:$28 sps:$4 sm:$0xff]  }
  0xec   :  { %v5958_v6 = vsub.s32 0, %v5955_v5  ;;  %v244_v7 = vld [vmem:[%s6715_s2] sm:$0xf]  ;;  %v5964_v10 = vsub.s32 1, %v5955_v5  ;;  %v5970_v20 = vsub.s32 2, %v5955_v5  ;;  %v5973_v33 = vsub.s32 3, %v5955_v5 }
  0xed   :  { %4407 = vmatpush3.bf16.msra.mxu1 %v4785_v53 }
  0xee   :  { %4408 = vmatprep.subr.bf16.mxu1 %v4786_v58  ;;  %v249_v11 = vrot.slane %v244_v7, %v5958_v6  ;;  %v253_v12 = vrot.slane %v244_v7, %v5964_v10  ;;  %v257_v35 = vrot.slane %v244_v7, %v5970_v20  ;;  %v261_v37 = vrot.slane %v244_v7, %v5973_v33 }
  0xf1   :  { %4409 = vmatpush3.bf16.msra.mxu1 %v4787_v59 }
  0xf2   :  { %4410 = vmatprep.subr.bf16.mxu1 %v4788_v62 }
  0xf5   :  { %4411 = vmatpush3.bf16.msra.mxu1 %v4789_v63 }
  0xf6   :  { %4412 = vmatprep.subr.bf16.mxu1 %v4790_v2 }
  0xf9   :  { %4413 = vmatpush3.bf16.msra.mxu1 %v4791_v3 }
 0x102   :  { %v1284_v47 = vpop.f32.mrf.mxu0 }
 0x103   :  { %v1325_v48 = vpop.f32.mrf.mxu1  ;;  %v1285_v13 = vadd.f32 %v1284_v47, %v249_v11 }
 0x104   :  { %v1286_v49 = vpop.f32.mrf.mxu0 }
 0x105   :  { %v1327_v50 = vpop.f32.mrf.mxu1  ;;  %v1287_v14 = vadd.f32 %v1286_v49, %v253_v12  ;;  %v1326_v15 = vadd.f32 %v1325_v48, %v1285_v13 }
 0x106   :  { %v1288_v54 = vpop.f32.mrf.mxu0 }
 0x107   :  { %v1329_v55 = vpop.f32.mrf.mxu1  ;;  %v1328_v18 = vadd.f32 %v1327_v50, %v1287_v14 }
 0x108   :  { %v1289_v56 = vpop.f32.mrf.mxu0 }
 0x109   :  { %v1330_v57 = vpop.f32.mrf.mxu1 }
 0x10b   :  { %v1407_v60 = vpop.f32.mrf.mxu1 }
 0x10d   :  { %v1409_v61 = vpop.f32.mrf.mxu1 }
 0x10f   :  { %v1411_v0 = vpop.f32.mrf.mxu1 }
 0x111   :  { %v1412_v1 = vpop.f32.mrf.mxu1 }
 0x142   :  { %v1366_v17 = vpop.f32.mrf.mxu0 }
 0x143   :  { %v1367_v21 = vadd.f32 %v1366_v17, %v1326_v15  ;;  %v4104_v15 = vld [vmem:[%s6717_s4] ss:$0 sm:$0xff] }
 0x144   :  { %v1368_v22 = vpop.f32.mrf.mxu0 }
 0x145   :  { %v1408_v23 = vadd.f32 %v1407_v60, %v1367_v21  ;;  %v1369_v24 = vadd.f32 %v1368_v22, %v1328_v18  ;;  %v1931_v60 = vld [vmem:[%s6718_s5] sm:$0xff] }
 0x146   :  { %v1370_v25 = vpop.f32.mrf.mxu0  ;;  %v4138_v62 = vcombine.high %v1931_v60, %v1931_v60  ;;  %v4137_v63 = vcombine.low %v1931_v60, %v1931_v60  ;;  %v4852_v60 = vld [vmem:[%s6720_s7 + $0x314] ss:$28 sps:$4 sm:$0xff]  }
 0x147   :  { %v1410_v26 = vadd.f32 %v1409_v61, %v1369_v24  ;;  %v1578_v27 = vmax.f32 %v1408_v23, 0.0  ;;  %v1932_v61 = vld [vmem:[%s6718_s5 + $0x8] sm:$0xff] }
 0x148   :  { %v1371_v28 = vpop.f32.mrf.mxu0  ;;  %v4140_v0 = vcombine.high %v1932_v61, %v1932_v61  ;;  %v4139_v1 = vcombine.low %v1932_v61, %v1932_v61  ;;  %4141 = vmatprep.subr.msk.bf16.mxu0 %vm1969_vm1, %v4138_v62  ;;  %v1971_v2 = vsel %vm1969_vm1, %v4137_v63, 0  ;;  %v4855_v61 = vld [vmem:[%s6720_s7 + $0x694] ss:$28 sps:$4 sm:$0xff]  }
 0x149   :  { %v1579_v29 = vmax.f32 %v1410_v26, 0.0  ;;  %v1582_v31 = vpack.c.bf16 %v1578_v27, %v1578_v27  ;;  %v4796_v27 = vld [vmem:[%s6720_s7 + $0x188] ss:$28 sps:$4 sm:$0xff]   ;;  %v4850_v62 = vld [vmem:[%s6720_s7 + $0x310] ss:$28 sps:$4 sm:$0xff]  }
 0x14a   :  { %4143 = vmatprep.subr.msk.bf16.mxu1 %vm1969_vm1, %v4140_v0  ;;  %v1977_v3 = vsel %vm1969_vm1, %v4139_v1, 0  ;;  %v4799_v28 = vld [vmem:[%s6720_s7 + $0x508] ss:$28 sps:$4 sm:$0xff]   ;;  %v4853_v63 = vld [vmem:[%s6720_s7 + $0x690] ss:$28 sps:$4 sm:$0xff]  }
 0x14b   :  { %v1448_v30 = vpop.f32.mrf.mxu1  ;;  %v1583_v9 = vpack.c.bf16 %v1579_v29, %v1579_v29  ;;  %v4858_v0 = vld [vmem:[%s6720_s7 + $0x2dc] ss:$28 sps:$4 sm:$0xff]  }
 0x14c   :  { %v1449_v39 = vadd.f32 %v1448_v30, %v257_v35  ;;  %v4804_v30 = vld [vmem:[%s6720_s7 + $0x154] ss:$28 sps:$4 sm:$0xff]   ;;  %v4861_v1 = vld [vmem:[%s6720_s7 + $0x65c] ss:$28 sps:$4 sm:$0xff]  }
 0x14d   :  { %v1450_v32 = vpop.f32.mrf.mxu1  ;;  %1881 = vmatprep.mubr.bf16.mxu0 %v1583_v9  ;;  %v4807_v9 = vld [vmem:[%s6720_s7 + $0x4d4] ss:$28 sps:$4 sm:$0xff]  }
 0x14e   :  { %1882 = vmatmul.mubr.bf16.vlgmr.msra.gmra.mxu0 %v1582_v31  ;;  %v1451_v40 = vadd.f32 %v1450_v32, %v261_v37  ;;  %v4802_v31 = vld [vmem:[%s6720_s7 + $0x150] ss:$28 sps:$4 sm:$0xff]   ;;  %v4811_v35 = vld [vmem:[%s6720_s7 + $0x498] ss:$28 sps:$4 sm:$0xff]   ;;  %v4819_v37 = vld [vmem:[%s6720_s7 + $0x464] ss:$28 sps:$4 sm:$0xff]  }
 0x14f   :  { %v1452_v52 = vpop.f32.mrf.mxu1  ;;  %2014 = vmatprep.mubr.bf16.mxu0 %v5166_v16  ;;  %1997 = vmatpush1.bf16.msra.mxu0 %v1971_v2  ;;  %v4805_v32 = vld [vmem:[%s6720_s7 + $0x4d0] ss:$28 sps:$4 sm:$0xff]   ;;  %v4856_v2 = vld [vmem:[%s6720_s7 + $0x2d8] ss:$28 sps:$4 sm:$0xff]  }
 0x150   :  { %v4810_v52 = vld [vmem:[%s6720_s7 + $0x11c] ss:$28 sps:$4 sm:$0xff]  }
 0x151   :  { %v1453_v19 = vpop.f32.mrf.mxu1 }
 0x152   :  { %v4813_v19 = vld [vmem:[%s6720_s7 + $0x49c] ss:$28 sps:$4 sm:$0xff]  }
 0x182   :  { %v1489_v34 = vpop.f32.mrf.mxu0 }
 0x183   :  { %v1490_v41 = vadd.f32 %v1489_v34, %v1449_v39  ;;  %v4808_v34 = vld [vmem:[%s6720_s7 + $0x118] ss:$28 sps:$4 sm:$0xff]   ;;  %v4817_v39 = vld [vmem:[%s6720_s7 + $0x460] ss:$28 sps:$4 sm:$0xff]  }
 0x184   :  { %v1491_v8 = vpop.f32.mrf.mxu0 }
 0x185   :  { %v1492_v44 = vadd.f32 %v1491_v8, %v1451_v40  ;;  %v4816_v8 = vld [vmem:[%s6720_s7 + $0xe4] ss:$28 sps:$4 sm:$0xff]   ;;  %v4825_v40 = vld [vmem:[%s6720_s7 + $0x42c] ss:$28 sps:$4 sm:$0xff]  }
 0x186   :  { %v1493_v38 = vpop.f32.mrf.mxu0 }
 0x187   :  { %v4814_v38 = vld [vmem:[%s6720_s7 + $0xe0] ss:$28 sps:$4 sm:$0xff]  }
 0x188   :  { %v1494_v36 = vpop.f32.mrf.mxu0 }
 0x189   :  { %v4822_v36 = vld [vmem:[%s6720_s7 + $0xac] ss:$28 sps:$4 sm:$0xff]  }
 0x18a   :  { %v1571_v43 = vpop.f32.mrf.mxu0 }
 0x18b   :  { %v1530_v42 = vpop.f32.mrf.mxu1 }
 0x18c   :  { %v1531_v45 = vadd.f32 %v1530_v42, %v1490_v41  ;;  %v1573_v47 = vpop.f32.mrf.mxu0  ;;  %v4820_v41 = vld [vmem:[%s6720_s7 + $0xa8] ss:$28 sps:$4 sm:$0xff]  }
 0x18d   :  { %v1532_v46 = vpop.f32.mrf.mxu1  ;;  %v4823_v42 = vld [vmem:[%s6720_s7 + $0x428] ss:$28 sps:$4 sm:$0xff]  }
 0x18e   :  { %v1572_v48 = vadd.f32 %v1571_v43, %v1531_v45  ;;  %v1533_v49 = vadd.f32 %v1532_v46, %v1492_v44  ;;  %v1575_v51 = vpop.f32.mrf.mxu0  ;;  %v4828_v43 = vld [vmem:[%s6720_s7 + $0x74] ss:$28 sps:$4 sm:$0xff]  }
 0x18f   :  { %v1534_v50 = vpop.f32.mrf.mxu1  ;;  %v4831_v44 = vld [vmem:[%s6720_s7 + $0x3f4] ss:$28 sps:$4 sm:$0xff]   ;;  %v4840_v51 = vld [vmem:[%s6720_s7 + $0x4] ss:$28 sps:$4 sm:$0xff]  }
 0x190   :  { %v1574_v53 = vadd.f32 %v1573_v47, %v1533_v49  ;;  %v1580_v54 = vmax.f32 %v1572_v48, 0.0  ;;  %v1576_v56 = vpop.f32.mrf.mxu0  ;;  %v4826_v45 = vld [vmem:[%s6720_s7 + $0x70] ss:$28 sps:$4 sm:$0xff]   ;;  %v4834_v47 = vld [vmem:[%s6720_s7 + $0x3c] ss:$28 sps:$4 sm:$0xff]  }
 0x191   :  { %v1535_v55 = vpop.f32.mrf.mxu1  ;;  %v4829_v46 = vld [vmem:[%s6720_s7 + $0x3f0] ss:$28 sps:$4 sm:$0xff]   ;;  %v4837_v48 = vld [vmem:[%s6720_s7 + $0x3bc] ss:$28 sps:$4 sm:$0xff]  }
 0x192   :  { %v1581_v57 = vmax.f32 %v1574_v53, 0.0  ;;  %v1584_v59 = vpack.c.bf16 %v1580_v54, %v1580_v54  ;;  %v4832_v49 = vld [vmem:[%s6720_s7 + $0x38] ss:$28 sps:$4 sm:$0xff]   ;;  %v4843_v53 = vld [vmem:[%s6720_s7 + $0x384] ss:$28 sps:$4 sm:$0xff]  }
 0x193   :  { %v4835_v50 = vld [vmem:[%s6720_s7 + $0x3b8] ss:$28 sps:$4 sm:$0xff]   ;;  %v4838_v54 = vld [vmem:[%s6720_s7] ss:$28 sps:$4 sm:$0xff]   ;;  %v4846_v56 = vld [vmem:[%s6720_s7 + $0x34c] ss:$28 sps:$4 sm:$0xff]  }
 0x194   :  { %v1585_v58 = vpack.c.bf16 %v1581_v57, %v1581_v57  ;;  %v4841_v55 = vld [vmem:[%s6720_s7 + $0x380] ss:$28 sps:$4 sm:$0xff]   ;;  %v4849_v57 = vld [vmem:[%s6720_s7 + $0x6cc] ss:$28 sps:$4 sm:$0xff]  }
 0x196   :  { %1921 = vmatprep.mubr.bf16.mxu1 %v1585_v58  ;;  %v4844_v58 = vld [vmem:[%s6720_s7 + $0x348] ss:$28 sps:$4 sm:$0xff]  }
 0x197   :  { %1922 = vmatmul.mubr.bf16.vlgmr.msra.gmra.mxu1 %v1584_v59  ;;  %v4847_v59 = vld [vmem:[%s6720_s7 + $0x6c8] ss:$28 sps:$4 sm:$0xff]  }
 0x198   :  { %2055 = vmatprep.mubr.bf16.mxu1 %v5166_v16  ;;  %2038 = vmatpush1.bf16.msra.mxu1 %v1977_v3  ;;  %v4798_v16 = vld [vmem:[%s6720_s7 + $0x18c] ss:$28 sps:$4 sm:$0xff]   ;;  %v4859_v3 = vld [vmem:[%s6720_s7 + $0x658] ss:$28 sps:$4 sm:$0xff]  }
 0x199   :  { %3517 = vmatprep.subr.bf16.mxu0 %v4798_v16  ;;  %3558 = vmatprep.subr.bf16.mxu1 %v4801_v4  ;;  %v4864_v16 = vld [vmem:[%s6720_s7 + $0x2a4] ss:$28 sps:$4 sm:$0xff]  }
 0x19a   :  { %v4867_v4 = vld [vmem:[%s6720_s7 + $0x624] ss:$28 sps:$4 sm:$0xff]  }
 0x20e   :  { %v4392_v7 = vpop.f32.mrf.mxu0 }
 0x210   :  { %v4393_v11 = vpop.f32.mrf.mxu0 }
 0x211   :  { %v4394_v12 = vadd.f32 %v4393_v11, %v4392_v7  ;;  %v4862_v7 = vld [vmem:[%s6720_s7 + $0x2a0] ss:$28 sps:$4 sm:$0xff]  }
 0x212   :  { %v4395_v13 = vpop.f32.mrf.mxu0  ;;  %v4865_v11 = vld [vmem:[%s6720_s7 + $0x620] ss:$28 sps:$4 sm:$0xff]  }
 0x213   :  { %v1884_v21 = vadd.f32 %v4394_v12, %v4104_v15  ;;  %v4870_v12 = vld [vmem:[%s6720_s7 + $0x26c] ss:$28 sps:$4 sm:$0xff]  }
 0x214   :  { %v4396_v14 = vpop.f32.mrf.mxu0  ;;  %v4873_v13 = vld [vmem:[%s6720_s7 + $0x5ec] ss:$28 sps:$4 sm:$0xff]  }
 0x215   :  { %v4868_v14 = vld [vmem:[%s6720_s7 + $0x268] ss:$28 sps:$4 sm:$0xff]  }
 0x216   :  { %v4871_v15 = vld [vmem:[%s6720_s7 + $0x5e8] ss:$28 sps:$4 sm:$0xff]  }
 0x257   :  { %v4414_v17 = vpop.f32.mrf.mxu1 }
 0x259   :  { %v4415_v18 = vpop.f32.mrf.mxu1 }
 0x25a   :  { %v4416_v22 = vadd.f32 %v4415_v18, %v4414_v17  ;;  %v4876_v17 = vld [vmem:[%s6720_s7 + $0x234] ss:$28 sps:$4 sm:$0xff]  }
 0x25b   :  { %v4417_v23 = vpop.f32.mrf.mxu1  ;;  %v4879_v18 = vld [vmem:[%s6720_s7 + $0x5b4] ss:$28 sps:$4 sm:$0xff]  }
 0x25c   :  { %v1924_v24 = vadd.f32 %v4416_v22, %v1884_v21  ;;  %v4874_v21 = vld [vmem:[%s6720_s7 + $0x230] ss:$28 sps:$4 sm:$0xff]   ;;  %v4882_v23 = vld [vmem:[%s6720_s7 + $0x1fc] ss:$28 sps:$4 sm:$0xff]  }
 0x25d   :  { %v4418_v25 = vpop.f32.mrf.mxu1  ;;  %v4877_v22 = vld [vmem:[%s6720_s7 + $0x5b0] ss:$28 sps:$4 sm:$0xff]  }
 0x25e   :  { %v1929_v26 = vmax.f32 %v1924_v24, 0.0  ;;  %v4885_v24 = vld [vmem:[%s6720_s7 + $0x57c] ss:$28 sps:$4 sm:$0xff]  }
 0x25f   :  { %v4880_v25 = vld [vmem:[%s6720_s7 + $0x1f8] ss:$28 sps:$4 sm:$0xff]  }
 0x260   :  { %v1930_v29 = vpack.c.bf16 %v1929_v26, %v1929_v26  ;;  %v4883_v26 = vld [vmem:[%s6720_s7 + $0x578] ss:$28 sps:$4 sm:$0xff]  }
 0x262   :  { %4142 = vmatmul.mubr.msk.bf16.vlgmr.msra.gmra.mxu0 %vm1965_vm2, %v1930_v29  ;;  %4144 = vmatmul.mubr.msk.bf16.vlgmr.msra.gmra.mxu1 %vm1965_vm2, %v1930_v29  ;;  %v4886_v29 = vld [vmem:[%s6720_s7 + $0x1c0] ss:$28 sps:$4 sm:$0xff]  }
 0x263   :  { %3518 = vmatpush1.bf16.msra.mxu0 %v4796_v27  ;;  %3559 = vmatpush1.bf16.msra.mxu1 %v4799_v28  ;;  %v4888_v27 = vld [vmem:[%s6720_s7 + $0x1c4] ss:$28 sps:$4 sm:$0xff]  }
 0x264   :  { %3519 = vmatprep.subr.bf16.mxu0 %v4804_v30  ;;  %3560 = vmatprep.subr.bf16.mxu1 %v4807_v9  ;;  %v4891_v28 = vld [vmem:[%s6720_s7 + $0x544] ss:$28 sps:$4 sm:$0xff]   ;;  %v4894_v9 = vld [vmem:[%s6720_s7 + $0x194] ss:$28 sps:$4 sm:$0xff]  }
 0x265   :  { %v4889_v30 = vld [vmem:[%s6720_s7 + $0x540] ss:$28 sps:$4 sm:$0xff]  }
 0x267   :  { %3520 = vmatpush1.bf16.msra.mxu0 %v4802_v31  ;;  %3561 = vmatpush1.bf16.msra.mxu1 %v4805_v32  ;;  %v4897_v31 = vld [vmem:[%s6720_s7 + $0x514] ss:$28 sps:$4 sm:$0xff]   ;;  %v1933_v32 = vld [vmem:[%s6719_s6] sm:$0xf] }
 0x268   :  { %3521 = vmatprep.subr.bf16.mxu0 %v4810_v52  ;;  %3562 = vmatprep.subr.bf16.mxu1 %v4813_v19  ;;  %v1938_v52 = vrot.slane %v1933_v32, %v5958_v6  ;;  %v1946_v19 = vrot.slane %v1933_v32, %v5970_v20 }
 0x26b   :  { %3522 = vmatpush1.bf16.msra.mxu0 %v4808_v34  ;;  %3563 = vmatpush1.bf16.msra.mxu1 %v4811_v35  ;;  %v1942_v34 = vrot.slane %v1933_v32, %v5964_v10  ;;  %v1950_v35 = vrot.slane %v1933_v32, %v5973_v33  ;;  %v4948_v32 = vld [vmem:[%s6720_s7 + $0x31c] ss:$28 sps:$4 sm:$0xff]  }
 0x26c   :  { %3523 = vmatprep.subr.bf16.mxu0 %v4816_v8  ;;  %3564 = vmatprep.subr.bf16.mxu1 %v4819_v37 }
 0x26f   :  { %3524 = vmatpush1.bf16.msra.mxu0 %v4814_v38  ;;  %3565 = vmatpush1.bf16.msra.mxu1 %v4817_v39 }
 0x270   :  { %3525 = vmatprep.subr.bf16.mxu0 %v4822_v36  ;;  %3566 = vmatprep.subr.bf16.mxu1 %v4825_v40 }
 0x273   :  { %3526 = vmatpush1.bf16.msra.mxu0 %v4820_v41  ;;  %3567 = vmatpush1.bf16.msra.mxu1 %v4823_v42 }
 0x274   :  { %3527 = vmatprep.subr.bf16.mxu0 %v4828_v43  ;;  %3568 = vmatprep.subr.bf16.mxu1 %v4831_v44 }
 0x277   :  { %3528 = vmatpush1.bf16.msra.mxu0 %v4826_v45  ;;  %3569 = vmatpush1.bf16.msra.mxu1 %v4829_v46 }
 0x278   :  { %3529 = vmatprep.subr.bf16.mxu0 %v4834_v47  ;;  %3570 = vmatprep.subr.bf16.mxu1 %v4837_v48 }
 0x27b   :  { %3530 = vmatpush1.bf16.msra.mxu0 %v4832_v49  ;;  %3571 = vmatpush1.bf16.msra.mxu1 %v4835_v50 }
 0x27c   :  { %3531 = vmatprep.subr.bf16.mxu0 %v4840_v51  ;;  %3572 = vmatprep.subr.bf16.mxu1 %v4843_v53 }
 0x27f   :  { %3532 = vmatpush1.bf16.msra.mxu0 %v4838_v54  ;;  %3573 = vmatpush1.bf16.msra.mxu1 %v4841_v55  ;;  %v4892_v54 = vld [vmem:[%s6720_s7 + $0x190] ss:$28 sps:$4 sm:$0xff]  }
 0x280   :  { %3533 = vmatprep.subr.bf16.mxu0 %v4846_v56  ;;  %3574 = vmatprep.subr.bf16.mxu1 %v4849_v57  ;;  %v4895_v55 = vld [vmem:[%s6720_s7 + $0x510] ss:$28 sps:$4 sm:$0xff]  }
 0x283   :  { %3534 = vmatpush2.bf16.msra.mxu0 %v4844_v58  ;;  %3575 = vmatpush2.bf16.msra.mxu1 %v4847_v59  ;;  %v4900_v58 = vld [vmem:[%s6720_s7 + $0x15c] ss:$28 sps:$4 sm:$0xff]  }
 0x284   :  { %3535 = vmatprep.subr.bf16.mxu0 %v4852_v60  ;;  %3576 = vmatprep.subr.bf16.mxu1 %v4855_v61  ;;  %v4903_v59 = vld [vmem:[%s6720_s7 + $0x4dc] ss:$28 sps:$4 sm:$0xff]  }
 0x285   :  { %v4898_v60 = vld [vmem:[%s6720_s7 + $0x158] ss:$28 sps:$4 sm:$0xff]  }
 0x286   :  { %v4901_v61 = vld [vmem:[%s6720_s7 + $0x4d8] ss:$28 sps:$4 sm:$0xff]  }
 0x287   :  { %3536 = vmatpush2.bf16.msra.mxu0 %v4850_v62  ;;  %3577 = vmatpush2.bf16.msra.mxu1 %v4853_v63  ;;  %v4906_v62 = vld [vmem:[%s6720_s7 + $0x124] ss:$28 sps:$4 sm:$0xff]  }
 0x288   :  { %3537 = vmatprep.subr.bf16.mxu0 %v4858_v0  ;;  %3578 = vmatprep.subr.bf16.mxu1 %v4861_v1  ;;  %v4909_v63 = vld [vmem:[%s6720_s7 + $0x4a4] ss:$28 sps:$4 sm:$0xff]  }
 0x289   :  { %v4904_v0 = vld [vmem:[%s6720_s7 + $0x120] ss:$28 sps:$4 sm:$0xff]  }
 0x28a   :  { %v4907_v1 = vld [vmem:[%s6720_s7 + $0x4a0] ss:$28 sps:$4 sm:$0xff]  }
 0x28b   :  { %3538 = vmatpush2.bf16.msra.mxu0 %v4856_v2  ;;  %3579 = vmatpush2.bf16.msra.mxu1 %v4859_v3  ;;  %v4912_v2 = vld [vmem:[%s6720_s7 + $0xec] ss:$28 sps:$4 sm:$0xff]  }
 0x28c   :  { %3539 = vmatprep.subr.bf16.mxu0 %v4864_v16  ;;  %3580 = vmatprep.subr.bf16.mxu1 %v4867_v4  ;;  %v4915_v3 = vld [vmem:[%s6720_s7 + $0x46c] ss:$28 sps:$4 sm:$0xff]  }
 0x28d   :  { %v4910_v16 = vld [vmem:[%s6720_s7 + $0xe8] ss:$28 sps:$4 sm:$0xff]  }
 0x28e   :  { %v4913_v4 = vld [vmem:[%s6720_s7 + $0x468] ss:$28 sps:$4 sm:$0xff]  }
 0x28f   :  { %3540 = vmatpush2.bf16.msra.mxu0 %v4862_v7  ;;  %3581 = vmatpush2.bf16.msra.mxu1 %v4865_v11  ;;  %v4918_v7 = vld [vmem:[%s6720_s7 + $0xb4] ss:$28 sps:$4 sm:$0xff]  }
 0x290   :  { %3541 = vmatprep.subr.bf16.mxu0 %v4870_v12  ;;  %3582 = vmatprep.subr.bf16.mxu1 %v4873_v13  ;;  %v4921_v11 = vld [vmem:[%s6720_s7 + $0x434] ss:$28 sps:$4 sm:$0xff]  }
 0x291   :  { %v4916_v12 = vld [vmem:[%s6720_s7 + $0xb0] ss:$28 sps:$4 sm:$0xff]  }
 0x292   :  { %v4919_v13 = vld [vmem:[%s6720_s7 + $0x430] ss:$28 sps:$4 sm:$0xff]  }
 0x293   :  { %3542 = vmatpush2.bf16.msra.mxu0 %v4868_v14  ;;  %3583 = vmatpush2.bf16.msra.mxu1 %v4871_v15  ;;  %v4924_v14 = vld [vmem:[%s6720_s7 + $0x7c] ss:$28 sps:$4 sm:$0xff]  }
 0x294   :  { %3543 = vmatprep.subr.bf16.mxu0 %v4876_v17  ;;  %3584 = vmatprep.subr.bf16.mxu1 %v4879_v18  ;;  %v4927_v15 = vld [vmem:[%s6720_s7 + $0x3fc] ss:$28 sps:$4 sm:$0xff]  }
 0x295   :  { %v4922_v17 = vld [vmem:[%s6720_s7 + $0x78] ss:$28 sps:$4 sm:$0xff]  }
 0x296   :  { %v4925_v18 = vld [vmem:[%s6720_s7 + $0x3f8] ss:$28 sps:$4 sm:$0xff]  }
 0x297   :  { %3544 = vmatpush2.bf16.msra.mxu0 %v4874_v21  ;;  %3585 = vmatpush2.bf16.msra.mxu1 %v4877_v22  ;;  %v4930_v21 = vld [vmem:[%s6720_s7 + $0x44] ss:$28 sps:$4 sm:$0xff]  }
 0x298   :  { %3545 = vmatprep.subr.bf16.mxu0 %v4882_v23  ;;  %3586 = vmatprep.subr.bf16.mxu1 %v4885_v24  ;;  %v4933_v22 = vld [vmem:[%s6720_s7 + $0x3c4] ss:$28 sps:$4 sm:$0xff]  }
 0x299   :  { %v4928_v23 = vld [vmem:[%s6720_s7 + $0x40] ss:$28 sps:$4 sm:$0xff]  }
 0x29a   :  { %v4931_v24 = vld [vmem:[%s6720_s7 + $0x3c0] ss:$28 sps:$4 sm:$0xff]  }
 0x29b   :  { %3546 = vmatpush2.bf16.msra.mxu0 %v4880_v25  ;;  %3587 = vmatpush2.bf16.msra.mxu1 %v4883_v26  ;;  %v4936_v25 = vld [vmem:[%s6720_s7 + $0xc] ss:$28 sps:$4 sm:$0xff]  }
 0x29c   :  { %3547 = vmatprep.subr.bf16.mxu0 %v4888_v27  ;;  %3588 = vmatprep.subr.bf16.mxu1 %v4891_v28  ;;  %v4939_v26 = vld [vmem:[%s6720_s7 + $0x38c] ss:$28 sps:$4 sm:$0xff]  }
 0x29d   :  { %v4934_v27 = vld [vmem:[%s6720_s7 + $0x8] ss:$28 sps:$4 sm:$0xff]  }
 0x29e   :  { %v4937_v28 = vld [vmem:[%s6720_s7 + $0x388] ss:$28 sps:$4 sm:$0xff]  }
 0x29f   :  { %3548 = vmatpush2.bf16.msra.mxu0 %v4886_v29  ;;  %3589 = vmatpush2.bf16.msra.mxu1 %v4889_v30  ;;  %v4942_v29 = vld [vmem:[%s6720_s7 + $0x354] ss:$28 sps:$4 sm:$0xff]  }
 0x2a0   :  { %3599 = vmatprep.subr.bf16.mxu0 %v4894_v9  ;;  %3640 = vmatprep.subr.bf16.mxu1 %v4897_v31  ;;  %v4945_v30 = vld [vmem:[%s6720_s7 + $0x6d4] ss:$28 sps:$4 sm:$0xff]  }
 0x2a1   :  { %v4940_v9 = vld [vmem:[%s6720_s7 + $0x350] ss:$28 sps:$4 sm:$0xff]  }
 0x2a2   :  { %v4943_v31 = vld [vmem:[%s6720_s7 + $0x6d0] ss:$28 sps:$4 sm:$0xff]  }
 0x322   :  { %v2016_v8 = vpop.f32.mrf.mxu0  ;;  %v2057_v37 = vpop.f32.mrf.mxu1 }
 0x323   :  { %v2017_v38 = vadd.f32 %v2016_v8, %v1938_v52  ;;  %v2058_v39 = vadd.f32 %v2057_v37, %v1946_v19  ;;  %v4951_v52 = vld [vmem:[%s6720_s7 + $0x69c] ss:$28 sps:$4 sm:$0xff]   ;;  %v4957_v8 = vld [vmem:[%s6720_s7 + $0x664] ss:$28 sps:$4 sm:$0xff]  }
 0x324   :  { %v2018_v36 = vpop.f32.mrf.mxu0  ;;  %v2059_v40 = vpop.f32.mrf.mxu1  ;;  %v4946_v19 = vld [vmem:[%s6720_s7 + $0x318] ss:$28 sps:$4 sm:$0xff]   ;;  %v4952_v37 = vld [vmem:[%s6720_s7 + $0x2e0] ss:$28 sps:$4 sm:$0xff]  }
 0x325   :  { %v2019_v41 = vadd.f32 %v2018_v36, %v1942_v34  ;;  %v2060_v42 = vadd.f32 %v2059_v40, %v1950_v35  ;;  %v2064_v43 = vmax.f32 %v2017_v38, 0.0  ;;  %v2066_v44 = vmax.f32 %v2058_v39, 0.0  ;;  %v4949_v34 = vld [vmem:[%s6720_s7 + $0x698] ss:$28 sps:$4 sm:$0xff]   ;;  %v4954_v35 = vld [vmem:[%s6720_s7 + $0x2e4] ss:$28 sps:$4 sm:$0xff]  }
 0x326   :  { %v2020_v45 = vpop.f32.mrf.mxu0  ;;  %v2061_v46 = vpop.f32.mrf.mxu1  ;;  %v4955_v38 = vld [vmem:[%s6720_s7 + $0x660] ss:$28 sps:$4 sm:$0xff]   ;;  %v4960_v39 = vld [vmem:[%s6720_s7 + $0x2ac] ss:$28 sps:$4 sm:$0xff]  }
 0x327   :  { %v2065_v47 = vmax.f32 %v2019_v41, 0.0  ;;  %v2067_v48 = vmax.f32 %v2060_v42, 0.0  ;;  %v6202_v56 = vpack.c.bf16 %v2064_v43, %v2064_v43  ;;  %v6204_v57 = vpack.c.bf16 %v2066_v44, %v2066_v44  ;;  %v4963_v36 = vld [vmem:[%s6720_s7 + $0x62c] ss:$28 sps:$4 sm:$0xff]   ;;  %v4966_v42 = vld [vmem:[%s6720_s7 + $0x274] ss:$28 sps:$4 sm:$0xff]  }
 0x328   :  { %v2021_v49 = vpop.f32.mrf.mxu0  ;;  %v2062_v50 = vpop.f32.mrf.mxu1  ;;  %v4958_v40 = vld [vmem:[%s6720_s7 + $0x2a8] ss:$28 sps:$4 sm:$0xff]   ;;  %v4969_v43 = vld [vmem:[%s6720_s7 + $0x5f4] ss:$28 sps:$4 sm:$0xff]   ;;  %v4972_v46 = vld [vmem:[%s6720_s7 + $0x23c] ss:$28 sps:$4 sm:$0xff]  }
 0x329   :  { %v6192_v51 = vpack.c.bf16 %v2065_v47, %v2065_v47  ;;  %v6194_v53 = vpack.c.bf16 %v2067_v48, %v2067_v48  ;;  %v4961_v41 = vld [vmem:[%s6720_s7 + $0x628] ss:$28 sps:$4 sm:$0xff]   ;;  %v4964_v44 = vld [vmem:[%s6720_s7 + $0x270] ss:$28 sps:$4 sm:$0xff]   ;;  %v4975_v47 = vld [vmem:[%s6720_s7 + $0x5bc] ss:$28 sps:$4 sm:$0xff]  }
 0x32a   :  { %v4967_v45 = vld [vmem:[%s6720_s7 + $0x5f0] ss:$28 sps:$4 sm:$0xff]   ;;  %v4970_v48 = vld [vmem:[%s6720_s7 + $0x238] ss:$28 sps:$4 sm:$0xff]   ;;  %v4978_v50 = vld [vmem:[%s6720_s7 + $0x204] ss:$28 sps:$4 sm:$0xff]  }
 0x32b   :  { %3549 = vmatprep.mubr.bf16.mxu0 %v6192_v51  ;;  %3590 = vmatprep.mubr.bf16.mxu1 %v6194_v53  ;;  %v4973_v49 = vld [vmem:[%s6720_s7 + $0x5b8] ss:$28 sps:$4 sm:$0xff]  }
 0x32c   :  { %3550 = vmatmul.mubr.bf16.vlgmr.msra.gmra.mxu0 %v6202_v56  ;;  %3591 = vmatmul.mubr.bf16.vlgmr.msra.gmra.mxu1 %v6204_v57 }
 0x32d   :  { %3600 = vmatpush1.bf16.msra.mxu0 %v4892_v54  ;;  %3641 = vmatpush1.bf16.msra.mxu1 %v4895_v55  ;;  %v4981_v54 = vld [vmem:[%s6720_s7 + $0x584] ss:$28 sps:$4 sm:$0xff]  }
 0x32e   :  { %3631 = vmatprep.mubr.bf16.mxu0 %v6192_v51  ;;  %3672 = vmatprep.mubr.bf16.mxu1 %v6194_v53  ;;  %v4976_v55 = vld [vmem:[%s6720_s7 + $0x200] ss:$28 sps:$4 sm:$0xff]  }
 0x32f   :  { %3601 = vmatprep.subr.bf16.mxu0 %v4900_v58  ;;  %3642 = vmatprep.subr.bf16.mxu1 %v4903_v59  ;;  %v4979_v58 = vld [vmem:[%s6720_s7 + $0x580] ss:$28 sps:$4 sm:$0xff]   ;;  %v4984_v59 = vld [vmem:[%s6720_s7 + $0x1cc] ss:$28 sps:$4 sm:$0xff]  }
 0x331   :  { %3602 = vmatpush1.bf16.msra.mxu0 %v4898_v60  ;;  %3643 = vmatpush1.bf16.msra.mxu1 %v4901_v61  ;;  %v4987_v60 = vld [vmem:[%s6720_s7 + $0x54c] ss:$28 sps:$4 sm:$0xff]  }
 0x332   :  { %3603 = vmatprep.subr.bf16.mxu0 %v4906_v62  ;;  %3644 = vmatprep.subr.bf16.mxu1 %v4909_v63  ;;  %v4982_v61 = vld [vmem:[%s6720_s7 + $0x1c8] ss:$28 sps:$4 sm:$0xff]   ;;  %v4990_v63 = vld [vmem:[%s6720_s7 + $0x19c] ss:$28 sps:$4 sm:$0xff]  }
 0x333   :  { %v4985_v62 = vld [vmem:[%s6720_s7 + $0x548] ss:$28 sps:$4 sm:$0xff]  }
 0x335   :  { %3604 = vmatpush1.bf16.msra.mxu0 %v4904_v0  ;;  %3645 = vmatpush1.bf16.msra.mxu1 %v4907_v1  ;;  %v4993_v0 = vld [vmem:[%s6720_s7 + $0x51c] ss:$28 sps:$4 sm:$0xff]  }
 0x336   :  { %3605 = vmatprep.subr.bf16.mxu0 %v4912_v2  ;;  %3646 = vmatprep.subr.bf16.mxu1 %v4915_v3  ;;  %v4988_v1 = vld [vmem:[%s6720_s7 + $0x198] ss:$28 sps:$4 sm:$0xff]   ;;  %v4996_v3 = vld [vmem:[%s6720_s7 + $0x164] ss:$28 sps:$4 sm:$0xff]  }
 0x337   :  { %v4991_v2 = vld [vmem:[%s6720_s7 + $0x518] ss:$28 sps:$4 sm:$0xff]  }
 0x339   :  { %3606 = vmatpush1.bf16.msra.mxu0 %v4910_v16  ;;  %3647 = vmatpush1.bf16.msra.mxu1 %v4913_v4  ;;  %v4999_v16 = vld [vmem:[%s6720_s7 + $0x4e4] ss:$28 sps:$4 sm:$0xff]  }
 0x33a   :  { %3607 = vmatprep.subr.bf16.mxu0 %v4918_v7  ;;  %3648 = vmatprep.subr.bf16.mxu1 %v4921_v11  ;;  %v4994_v4 = vld [vmem:[%s6720_s7 + $0x160] ss:$28 sps:$4 sm:$0xff]   ;;  %v5002_v11 = vld [vmem:[%s6720_s7 + $0x12c] ss:$28 sps:$4 sm:$0xff]  }
 0x33b   :  { %v4997_v7 = vld [vmem:[%s6720_s7 + $0x4e0] ss:$28 sps:$4 sm:$0xff]  }
 0x33d   :  { %3608 = vmatpush1.bf16.msra.mxu0 %v4916_v12  ;;  %3649 = vmatpush1.bf16.msra.mxu1 %v4919_v13  ;;  %v5005_v12 = vld [vmem:[%s6720_s7 + $0x4ac] ss:$28 sps:$4 sm:$0xff]  }
 0x33e   :  { %3609 = vmatprep.subr.bf16.mxu0 %v4924_v14  ;;  %3650 = vmatprep.subr.bf16.mxu1 %v4927_v15  ;;  %v5000_v13 = vld [vmem:[%s6720_s7 + $0x128] ss:$28 sps:$4 sm:$0xff]   ;;  %v5008_v15 = vld [vmem:[%s6720_s7 + $0xf4] ss:$28 sps:$4 sm:$0xff]  }
 0x33f   :  { %v5003_v14 = vld [vmem:[%s6720_s7 + $0x4a8] ss:$28 sps:$4 sm:$0xff]  }
 0x341   :  { %3610 = vmatpush1.bf16.msra.mxu0 %v4922_v17  ;;  %3651 = vmatpush1.bf16.msra.mxu1 %v4925_v18  ;;  %v5011_v17 = vld [vmem:[%s6720_s7 + $0x474] ss:$28 sps:$4 sm:$0xff]  }
 0x342   :  { %3611 = vmatprep.subr.bf16.mxu0 %v4930_v21  ;;  %3652 = vmatprep.subr.bf16.mxu1 %v4933_v22  ;;  %v5006_v18 = vld [vmem:[%s6720_s7 + $0xf0] ss:$28 sps:$4 sm:$0xff]   ;;  %v5014_v22 = vld [vmem:[%s6720_s7 + $0xbc] ss:$28 sps:$4 sm:$0xff]  }
 0x343   :  { %v5009_v21 = vld [vmem:[%s6720_s7 + $0x470] ss:$28 sps:$4 sm:$0xff]  }
 0x345   :  { %3612 = vmatpush1.bf16.msra.mxu0 %v4928_v23  ;;  %3653 = vmatpush1.bf16.msra.mxu1 %v4931_v24  ;;  %v5017_v23 = vld [vmem:[%s6720_s7 + $0x43c] ss:$28 sps:$4 sm:$0xff]  }
 0x346   :  { %3613 = vmatprep.subr.bf16.mxu0 %v4936_v25  ;;  %3654 = vmatprep.subr.bf16.mxu1 %v4939_v26  ;;  %v5012_v24 = vld [vmem:[%s6720_s7 + $0xb8] ss:$28 sps:$4 sm:$0xff]   ;;  %v5020_v26 = vld [vmem:[%s6720_s7 + $0x84] ss:$28 sps:$4 sm:$0xff]  }
 0x347   :  { %v5015_v25 = vld [vmem:[%s6720_s7 + $0x438] ss:$28 sps:$4 sm:$0xff]  }
 0x349   :  { %3614 = vmatpush1.bf16.msra.mxu0 %v4934_v27  ;;  %3655 = vmatpush1.bf16.msra.mxu1 %v4937_v28  ;;  %v5023_v27 = vld [vmem:[%s6720_s7 + $0x404] ss:$28 sps:$4 sm:$0xff]  }
 0x34a   :  { %3615 = vmatprep.subr.bf16.mxu0 %v4942_v29  ;;  %3656 = vmatprep.subr.bf16.mxu1 %v4945_v30  ;;  %v5018_v28 = vld [vmem:[%s6720_s7 + $0x80] ss:$28 sps:$4 sm:$0xff]   ;;  %v5026_v30 = vld [vmem:[%s6720_s7 + $0x4c] ss:$28 sps:$4 sm:$0xff]  }
 0x34b   :  { %v5021_v29 = vld [vmem:[%s6720_s7 + $0x400] ss:$28 sps:$4 sm:$0xff]  }
 0x34d   :  { %3616 = vmatpush2.bf16.msra.mxu0 %v4940_v9  ;;  %3657 = vmatpush2.bf16.msra.mxu1 %v4943_v31  ;;  %v5029_v9 = vld [vmem:[%s6720_s7 + $0x3cc] ss:$28 sps:$4 sm:$0xff]  }
 0x34e   :  { %3617 = vmatprep.subr.bf16.mxu0 %v4948_v32  ;;  %3658 = vmatprep.subr.bf16.mxu1 %v4951_v52  ;;  %v5024_v31 = vld [vmem:[%s6720_s7 + $0x48] ss:$28 sps:$4 sm:$0xff]   ;;  %v5032_v52 = vld [vmem:[%s6720_s7 + $0x14] ss:$28 sps:$4 sm:$0xff]  }
 0x34f   :  { %v5027_v32 = vld [vmem:[%s6720_s7 + $0x3c8] ss:$28 sps:$4 sm:$0xff]  }
 0x351   :  { %3618 = vmatpush2.bf16.msra.mxu0 %v4946_v19  ;;  %3659 = vmatpush2.bf16.msra.mxu1 %v4949_v34  ;;  %v5035_v19 = vld [vmem:[%s6720_s7 + $0x394] ss:$28 sps:$4 sm:$0xff]  }
 0x352   :  { %3619 = vmatprep.subr.bf16.mxu0 %v4954_v35  ;;  %3660 = vmatprep.subr.bf16.mxu1 %v4957_v8  ;;  %v5030_v34 = vld [vmem:[%s6720_s7 + $0x10] ss:$28 sps:$4 sm:$0xff]   ;;  %v5038_v8 = vld [vmem:[%s6720_s7 + $0x35c] ss:$28 sps:$4 sm:$0xff]  }
 0x353   :  { %v5033_v35 = vld [vmem:[%s6720_s7 + $0x390] ss:$28 sps:$4 sm:$0xff]  }
 0x355   :  { %3620 = vmatpush2.bf16.msra.mxu0 %v4952_v37  ;;  %3661 = vmatpush2.bf16.msra.mxu1 %v4955_v38  ;;  %v5041_v37 = vld [vmem:[%s6720_s7 + $0x6dc] ss:$28 sps:$4 sm:$0xff]  }
 0x356   :  { %3621 = vmatprep.subr.bf16.mxu0 %v4960_v39  ;;  %3662 = vmatprep.subr.bf16.mxu1 %v4963_v36  ;;  %v5036_v38 = vld [vmem:[%s6720_s7 + $0x358] ss:$28 sps:$4 sm:$0xff]   ;;  %v5044_v36 = vld [vmem:[%s6720_s7 + $0x324] ss:$28 sps:$4 sm:$0xff]  }
 0x357   :  { %v5039_v39 = vld [vmem:[%s6720_s7 + $0x6d8] ss:$28 sps:$4 sm:$0xff]  }
 0x359   :  { %3622 = vmatpush2.bf16.msra.mxu0 %v4958_v40  ;;  %3663 = vmatpush2.bf16.msra.mxu1 %v4961_v41  ;;  %v5047_v40 = vld [vmem:[%s6720_s7 + $0x6a4] ss:$28 sps:$4 sm:$0xff]  }
 0x35a   :  { %3623 = vmatprep.subr.bf16.mxu0 %v4966_v42  ;;  %3664 = vmatprep.subr.bf16.mxu1 %v4969_v43  ;;  %v5042_v41 = vld [vmem:[%s6720_s7 + $0x320] ss:$28 sps:$4 sm:$0xff]   ;;  %v5050_v43 = vld [vmem:[%s6720_s7 + $0x2ec] ss:$28 sps:$4 sm:$0xff]  }
 0x35b   :  { %v5045_v42 = vld [vmem:[%s6720_s7 + $0x6a0] ss:$28 sps:$4 sm:$0xff]  }
 0x35d   :  { %3624 = vmatpush2.bf16.msra.mxu0 %v4964_v44  ;;  %3665 = vmatpush2.bf16.msra.mxu1 %v4967_v45  ;;  %v5053_v44 = vld [vmem:[%s6720_s7 + $0x66c] ss:$28 sps:$4 sm:$0xff]  }
 0x35e   :  { %3625 = vmatprep.subr.bf16.mxu0 %v4972_v46  ;;  %3666 = vmatprep.subr.bf16.mxu1 %v4975_v47  ;;  %v5048_v45 = vld [vmem:[%s6720_s7 + $0x2e8] ss:$28 sps:$4 sm:$0xff]   ;;  %v5056_v47 = vld [vmem:[%s6720_s7 + $0x2b4] ss:$28 sps:$4 sm:$0xff]  }
 0x35f   :  { %v5051_v46 = vld [vmem:[%s6720_s7 + $0x668] ss:$28 sps:$4 sm:$0xff]  }
 0x361   :  { %3626 = vmatpush2.bf16.msra.mxu0 %v4970_v48  ;;  %3667 = vmatpush2.bf16.msra.mxu1 %v4973_v49  ;;  %v5059_v48 = vld [vmem:[%s6720_s7 + $0x634] ss:$28 sps:$4 sm:$0xff]  }
 0x362   :  { %3627 = vmatprep.subr.bf16.mxu0 %v4978_v50  ;;  %3668 = vmatprep.subr.bf16.mxu1 %v4981_v54  ;;  %v5054_v49 = vld [vmem:[%s6720_s7 + $0x2b0] ss:$28 sps:$4 sm:$0xff]   ;;  %v5062_v54 = vld [vmem:[%s6720_s7 + $0x27c] ss:$28 sps:$4 sm:$0xff]  }
 0x363   :  { %v5057_v50 = vld [vmem:[%s6720_s7 + $0x630] ss:$28 sps:$4 sm:$0xff]  }
 0x365   :  { %3628 = vmatpush2.bf16.msra.mxu0 %v4976_v55  ;;  %3669 = vmatpush2.bf16.msra.mxu1 %v4979_v58  ;;  %v5065_v55 = vld [vmem:[%s6720_s7 + $0x5fc] ss:$28 sps:$4 sm:$0xff]  }
 0x366   :  { %3629 = vmatprep.subr.bf16.mxu0 %v4984_v59  ;;  %3670 = vmatprep.subr.bf16.mxu1 %v4987_v60  ;;  %v5060_v58 = vld [vmem:[%s6720_s7 + $0x278] ss:$28 sps:$4 sm:$0xff]   ;;  %v5068_v60 = vld [vmem:[%s6720_s7 + $0x244] ss:$28 sps:$4 sm:$0xff]  }
 0x367   :  { %v5063_v59 = vld [vmem:[%s6720_s7 + $0x5f8] ss:$28 sps:$4 sm:$0xff]  }
 0x369   :  { %3630 = vmatpush2.bf16.msra.mxu0 %v4982_v61  ;;  %3671 = vmatpush2.bf16.msra.mxu1 %v4985_v62  ;;  %v5071_v61 = vld [vmem:[%s6720_s7 + $0x5c4] ss:$28 sps:$4 sm:$0xff]  }
 0x36a   :  { %3681 = vmatprep.subr.bf16.mxu0 %v4990_v63  ;;  %3722 = vmatprep.subr.bf16.mxu1 %v4993_v0  ;;  %v5066_v62 = vld [vmem:[%s6720_s7 + $0x240] ss:$28 sps:$4 sm:$0xff]   ;;  %v5074_v0 = vld [vmem:[%s6720_s7 + $0x20c] ss:$28 sps:$4 sm:$0xff]  }
 0x36b   :  { %v5069_v63 = vld [vmem:[%s6720_s7 + $0x5c0] ss:$28 sps:$4 sm:$0xff]  }
 0x36c   :  { %3632 = vmatmul.mubr.bf16.vlgmr.msra.gmra.mxu0 %v6202_v56  ;;  %3673 = vmatmul.mubr.bf16.vlgmr.msra.gmra.mxu1 %v6204_v57 }
 0x36d   :  { %3682 = vmatpush1.bf16.msra.mxu0 %v4988_v1  ;;  %3713 = vmatprep.mubr.bf16.mxu0 %v6192_v51  ;;  %v5077_v1 = vld [vmem:[%s6720_s7 + $0x58c] ss:$28 sps:$4 sm:$0xff]  }
 0x36e   :  { %3723 = vmatpush1.bf16.msra.mxu1 %v4991_v2  ;;  %3754 = vmatprep.mubr.bf16.mxu1 %v6194_v53  ;;  %v5072_v2 = vld [vmem:[%s6720_s7 + $0x208] ss:$28 sps:$4 sm:$0xff]  }
 0x36f   :  { %3683 = vmatprep.subr.bf16.mxu0 %v4996_v3  ;;  %3724 = vmatprep.subr.bf16.mxu1 %v4999_v16  ;;  %v5075_v3 = vld [vmem:[%s6720_s7 + $0x588] ss:$28 sps:$4 sm:$0xff]   ;;  %v5080_v16 = vld [vmem:[%s6720_s7 + $0x1d4] ss:$28 sps:$4 sm:$0xff]  }
 0x371   :  { %3684 = vmatpush1.bf16.msra.mxu0 %v4994_v4  ;;  %v5083_v4 = vld [vmem:[%s6720_s7 + $0x554] ss:$28 sps:$4 sm:$0xff]  }
 0x372   :  { %3725 = vmatpush1.bf16.msra.mxu1 %v4997_v7  ;;  %3685 = vmatprep.subr.bf16.mxu0 %v5002_v11  ;;  %v5078_v7 = vld [vmem:[%s6720_s7 + $0x1d0] ss:$28 sps:$4 sm:$0xff]  }
 0x373   :  { %3726 = vmatprep.subr.bf16.mxu1 %v5005_v12  ;;  %v5081_v11 = vld [vmem:[%s6720_s7 + $0x550] ss:$28 sps:$4 sm:$0xff]   ;;  %v5084_v12 = vld [vmem:[%s6720_s7 + $0x360] ss:$28 sps:$4 sm:$0xff]  }
 0x375   :  { %3686 = vmatpush1.bf16.msra.mxu0 %v5000_v13  ;;  %v5085_v13 = vld [vmem:[%s6720_s7 + $0x6e0] ss:$28 sps:$4 sm:$0xff]  }
 0x376   :  { %3727 = vmatpush1.bf16.msra.mxu1 %v5003_v14  ;;  %3687 = vmatprep.subr.bf16.mxu0 %v5008_v15  ;;  %v5086_v14 = vld [vmem:[%s6720_s7 + $0x1a0] ss:$28 sps:$4 sm:$0xff]  }
 0x377   :  { %3728 = vmatprep.subr.bf16.mxu1 %v5011_v17  ;;  %v5087_v15 = vld [vmem:[%s6720_s7 + $0x520] ss:$28 sps:$4 sm:$0xff]   ;;  %v5088_v17 = vld [vmem:[%s6720_s7 + $0x328] ss:$28 sps:$4 sm:$0xff]  }
 0x379   :  { %3688 = vmatpush1.bf16.msra.mxu0 %v5006_v18  ;;  %v5089_v18 = vld [vmem:[%s6720_s7 + $0x6a8] ss:$28 sps:$4 sm:$0xff]  }
 0x37a   :  { %3729 = vmatpush1.bf16.msra.mxu1 %v5009_v21  ;;  %3689 = vmatprep.subr.bf16.mxu0 %v5014_v22  ;;  %v5090_v21 = vld [vmem:[%s6720_s7 + $0x168] ss:$28 sps:$4 sm:$0xff]  }
 0x37b   :  { %3730 = vmatprep.subr.bf16.mxu1 %v5017_v23  ;;  %v5091_v22 = vld [vmem:[%s6720_s7 + $0x4e8] ss:$28 sps:$4 sm:$0xff]   ;;  %v5092_v23 = vld [vmem:[%s6720_s7 + $0x2f0] ss:$28 sps:$4 sm:$0xff]  }
 0x37d   :  { %3690 = vmatpush1.bf16.msra.mxu0 %v5012_v24  ;;  %v5093_v24 = vld [vmem:[%s6720_s7 + $0x670] ss:$28 sps:$4 sm:$0xff]  }
 0x37e   :  { %3731 = vmatpush1.bf16.msra.mxu1 %v5015_v25  ;;  %3691 = vmatprep.subr.bf16.mxu0 %v5020_v26  ;;  %v5095_v25 = vld [vmem:[%s6720_s7 + $0x4b0] ss:$28 sps:$4 sm:$0xff]   ;;  %v5097_v26 = vld [vmem:[%s6720_s7 + $0x638] ss:$28 sps:$4 sm:$0xff]  }
 0x37f   :  { %3732 = vmatprep.subr.bf16.mxu1 %v5023_v27  ;;  %v5098_v27 = vld [vmem:[%s6720_s7 + $0xf8] ss:$28 sps:$4 sm:$0xff]  }
 0x381   :  { %3692 = vmatpush1.bf16.msra.mxu0 %v5018_v28  ;;  %v5099_v28 = vld [vmem:[%s6720_s7 + $0x478] ss:$28 sps:$4 sm:$0xff]  }
 0x382   :  { %3733 = vmatpush1.bf16.msra.mxu1 %v5021_v29  ;;  %3693 = vmatprep.subr.bf16.mxu0 %v5026_v30  ;;  %v5100_v29 = vld [vmem:[%s6720_s7 + $0x280] ss:$28 sps:$4 sm:$0xff]  }
 0x383   :  { %3734 = vmatprep.subr.bf16.mxu1 %v5029_v9  ;;  %v5101_v30 = vld [vmem:[%s6720_s7 + $0x600] ss:$28 sps:$4 sm:$0xff]  }
 0x384   :  { %v5102_v9 = vld [vmem:[%s6720_s7 + $0xc0] ss:$28 sps:$4 sm:$0xff]  }
 0x385   :  { %3694 = vmatpush1.bf16.msra.mxu0 %v5024_v31  ;;  %v5103_v31 = vld [vmem:[%s6720_s7 + $0x440] ss:$28 sps:$4 sm:$0xff]  }
 0x386   :  { %3735 = vmatpush1.bf16.msra.mxu1 %v5027_v32  ;;  %3695 = vmatprep.subr.bf16.mxu0 %v5032_v52  ;;  %v5104_v32 = vld [vmem:[%s6720_s7 + $0x248] ss:$28 sps:$4 sm:$0xff]  }
 0x387   :  { %3736 = vmatprep.subr.bf16.mxu1 %v5035_v19  ;;  %v5105_v52 = vld [vmem:[%s6720_s7 + $0x5c8] ss:$28 sps:$4 sm:$0xff]  }
 0x388   :  { %v5106_v19 = vld [vmem:[%s6720_s7 + $0x88] ss:$28 sps:$4 sm:$0xff]  }
 0x389   :  { %3696 = vmatpush1.bf16.msra.mxu0 %v5030_v34  ;;  %v5107_v34 = vld [vmem:[%s6720_s7 + $0x408] ss:$28 sps:$4 sm:$0xff]  }
 0x38a   :  { %3737 = vmatpush1.bf16.msra.mxu1 %v5033_v35  ;;  %3697 = vmatprep.subr.bf16.mxu0 %v5038_v8  ;;  %v5108_v35 = vld [vmem:[%s6720_s7 + $0x210] ss:$28 sps:$4 sm:$0xff]  }
 0x38b   :  { %3738 = vmatprep.subr.bf16.mxu1 %v5041_v37  ;;  %v5109_v8 = vld [vmem:[%s6720_s7 + $0x590] ss:$28 sps:$4 sm:$0xff]  }
 0x38c   :  { %v5110_v37 = vld [vmem:[%s6720_s7 + $0x50] ss:$28 sps:$4 sm:$0xff]  }
 0x38d   :  { %3698 = vmatpush2.bf16.msra.mxu0 %v5036_v38  ;;  %v5111_v38 = vld [vmem:[%s6720_s7 + $0x3d0] ss:$28 sps:$4 sm:$0xff]  }
 0x38e   :  { %3739 = vmatpush2.bf16.msra.mxu1 %v5039_v39  ;;  %3699 = vmatprep.subr.bf16.mxu0 %v5044_v36  ;;  %v5112_v39 = vld [vmem:[%s6720_s7 + $0x1d8] ss:$28 sps:$4 sm:$0xff]  }
 0x38f   :  { %3740 = vmatprep.subr.bf16.mxu1 %v5047_v40  ;;  %v5113_v36 = vld [vmem:[%s6720_s7 + $0x558] ss:$28 sps:$4 sm:$0xff]  }
 0x390   :  { %v5114_v40 = vld [vmem:[%s6720_s7 + $0x18] ss:$28 sps:$4 sm:$0xff]  }
 0x391   :  { %3700 = vmatpush2.bf16.msra.mxu0 %v5042_v41  ;;  %v5115_v41 = vld [vmem:[%s6720_s7 + $0x398] ss:$28 sps:$4 sm:$0xff]  }
 0x392   :  { %3741 = vmatpush2.bf16.msra.mxu1 %v5045_v42  ;;  %3701 = vmatprep.subr.bf16.mxu0 %v5050_v43  ;;  %v6693_v42 = vld [vmem:[%s6721_s8] sm:$0x7f] }
 0x393   :  { %3742 = vmatprep.subr.bf16.mxu1 %v5053_v44  ;;  %v2333_v43 = vrot.slane %v6693_v42, %v5958_v6  ;;  %v2337_v44 = vrot.slane %v6693_v42, %v5964_v10 }
 0x395   :  { %3702 = vmatpush2.bf16.msra.mxu0 %v5048_v45 }
 0x396   :  { %3743 = vmatpush2.bf16.msra.mxu1 %v5051_v46  ;;  %3703 = vmatprep.subr.bf16.mxu0 %v5056_v47 }
 0x397   :  { %3744 = vmatprep.subr.bf16.mxu1 %v5059_v48 }
 0x399   :  { %3704 = vmatpush2.bf16.msra.mxu0 %v5054_v49 }
 0x39a   :  { %3745 = vmatpush2.bf16.msra.mxu1 %v5057_v50  ;;  %3705 = vmatprep.subr.bf16.mxu0 %v5062_v54 }
 0x39b   :  { %3746 = vmatprep.subr.bf16.mxu1 %v5065_v55 }
 0x39d   :  { %3706 = vmatpush2.bf16.msra.mxu0 %v5060_v58 }
 0x39e   :  { %3747 = vmatpush2.bf16.msra.mxu1 %v5063_v59  ;;  %3707 = vmatprep.subr.bf16.mxu0 %v5068_v60 }
 0x39f   :  { %3748 = vmatprep.subr.bf16.mxu1 %v5071_v61 }
 0x3a1   :  { %3708 = vmatpush2.bf16.msra.mxu0 %v5066_v62 }
 0x3a2   :  { %3749 = vmatpush2.bf16.msra.mxu1 %v5069_v63  ;;  %3709 = vmatprep.subr.bf16.mxu0 %v5074_v0 }
 0x3a3   :  { %3750 = vmatprep.subr.bf16.mxu1 %v5077_v1 }
 0x3a5   :  { %3710 = vmatpush2.bf16.msra.mxu0 %v5072_v2  ;;  %v2341_v2 = vrot.slane %v6693_v42, %v5970_v20 }
 0x3a6   :  { %3751 = vmatpush2.bf16.msra.mxu1 %v5075_v3  ;;  %3711 = vmatprep.subr.bf16.mxu0 %v5080_v16  ;;  %v2345_v3 = vrot.slane %v6693_v42, %v5973_v33 }
 0x3a7   :  { %3752 = vmatprep.subr.bf16.mxu1 %v5083_v4 }
 0x3a9   :  { %3712 = vmatpush2.bf16.msra.mxu0 %v5078_v7 }
 0x3aa   :  { %3753 = vmatpush2.bf16.msra.mxu1 %v5081_v11  ;;  %4420 = vmatprep.subr.bf16.mxu0 %v5084_v12 }
 0x3ab   :  { %4442 = vmatprep.subr.bf16.mxu1 %v5085_v13 }
 0x3ac   :  { %3714 = vmatmul.mubr.bf16.vlgmr.msra.gmra.mxu0 %v6202_v56 }
 0x3ad   :  { %3755 = vmatmul.mubr.bf16.vlgmr.msra.gmra.mxu1 %v6204_v57  ;;  %4421 = vmatpush3.bf16.msra.mxu0 %v5086_v14 }
 0x3ae   :  { %3795 = vmatprep.mubr.bf16.mxu0 %v6192_v51  ;;  %4443 = vmatpush3.bf16.msra.mxu1 %v5087_v15  ;;  %v5094_v51 = vld [vmem:[%s6720_s7 + $0x130] ss:$28 sps:$4 sm:$0xff]  }
 0x3af   :  { %3835 = vmatprep.mubr.bf16.mxu1 %v6194_v53  ;;  %4422 = vmatprep.subr.bf16.mxu0 %v5088_v17  ;;  %v5096_v53 = vld [vmem:[%s6720_s7 + $0x2b8] ss:$28 sps:$4 sm:$0xff]   ;;  %s5167_s7 = smov [#allocation2]  }
 0x3b0   :  { %4444 = vmatprep.subr.bf16.mxu1 %v5089_v18  ;;  %s3898_s8 = sshll.u32 %s5167_s7, 4  ;;  %s3899_s8 = int_to_ptr.vmem [resolvable:$true] %s3898_s8 }
 0x3b1   :  { %4423 = vmatpush3.bf16.msra.mxu0 %v5090_v21  ;;  %s5144_s1 = scalar_lea.vmem %s3899_s8, 896  ;;  %p5149_p1 = scmp.lt.s32.totalorder %s3899_s8, %s3899_s8 }
 0x3b2   :  { %4445 = vmatpush3.bf16.msra.mxu1 %v5091_v22  ;;  %4424 = vmatprep.subr.bf16.mxu0 %v5092_v23  ;;  %p5145_p0 = scmp.ne.s32.totalorder %s3899_s8, %s5144_s1  ;;  %p5150_p2 = scmp.lt.s32.totalorder %s5144_s1, %s5144_s1 }
 0x3b3   :  { %4446 = vmatprep.subr.bf16.mxu1 %v5093_v24 }
 0x3b4   :  { %p5151_p3 = por %p5150_p2, %p5149_p1 }
 0x3b5   :  { %4425 = vmatpush3.bf16.msra.mxu0 %v5094_v51 }
 0x3b6   :  { %4447 = vmatpush3.bf16.msra.mxu1 %v5095_v25  ;;  %4426 = vmatprep.subr.bf16.mxu0 %v5096_v53  ;;  %p5152_p4 = pnand %p5151_p3, %p5145_p0 }
 0x3b7   :  { %4448 = vmatprep.subr.bf16.mxu1 %v5097_v26 }
 0x3b9   :  { %4427 = vmatpush3.bf16.msra.mxu0 %v5098_v27  ;;  %v2348_v27 = vsub.s32 4, %v5955_v5 }
 0x3ba   :  { %4449 = vmatpush3.bf16.msra.mxu1 %v5099_v28  ;;  %4428 = vmatprep.subr.bf16.mxu0 %v5100_v29  ;;  %v2352_v28 = vsub.s32 5, %v5955_v5 }
 0x3bb   :  { %4450 = vmatprep.subr.bf16.mxu1 %v5101_v30  ;;  %v2349_v29 = vrot.slane %v6693_v42, %v2348_v27 }
 0x3bc   :  { %v2353_v30 = vrot.slane %v6693_v42, %v2352_v28 }
 0x3bd   :  { %4429 = vmatpush3.bf16.msra.mxu0 %v5102_v9 }
 0x3be   :  { %4451 = vmatpush3.bf16.msra.mxu1 %v5103_v31  ;;  %4430 = vmatprep.subr.bf16.mxu0 %v5104_v32 }
 0x3bf   :  { %4452 = vmatprep.subr.bf16.mxu1 %v5105_v52 }
 0x3c1   :  { %4431 = vmatpush3.bf16.msra.mxu0 %v5106_v19 }
 0x3c2   :  { %4453 = vmatpush3.bf16.msra.mxu1 %v5107_v34  ;;  %4432 = vmatprep.subr.bf16.mxu0 %v5108_v35 }
 0x3c3   :  { %4454 = vmatprep.subr.bf16.mxu1 %v5109_v8 }
 0x3c5   :  { %4433 = vmatpush3.bf16.msra.mxu0 %v5110_v37 }
 0x3c6   :  { %4455 = vmatpush3.bf16.msra.mxu1 %v5111_v38  ;;  %4434 = vmatprep.subr.bf16.mxu0 %v5112_v39 }
 0x3c7   :  { %4456 = vmatprep.subr.bf16.mxu1 %v5113_v36 }
 0x3c9   :  { %4435 = vmatpush3.bf16.msra.mxu0 %v5114_v40 }
 0x3ca   :  { %4457 = vmatpush3.bf16.msra.mxu1 %v5115_v41 }
 0x3cc   :  { %3796 = vmatmul.mubr.bf16.vlgmr.msra.gmra.mxu0 %v6202_v56 }
 0x3cd   :  { %3836 = vmatmul.mubr.bf16.vlgmr.msra.gmra.mxu1 %v6204_v57 }
 0x3ec   :  { %v3551_v45 = vpop.f32.mrf.mxu0  ;;  %v3592_v46 = vpop.f32.mrf.mxu1 }
 0x3ed   :  { %v3552_v47 = vadd.f32 %v3551_v45, %v2333_v43 }
 0x3ee   :  { %v3553_v48 = vpop.f32.mrf.mxu0  ;;  %v3594_v49 = vpop.f32.mrf.mxu1 }
 0x3ef   :  { %v3593_v50 = vadd.f32 %v3592_v46, %v3552_v47  ;;  %v3554_v56 = vadd.f32 %v3553_v48, %v2337_v44  ;;  %v2356_v47 = vsub.s32 6, %v5955_v5 }
 0x3f0   :  { %v3555_v54 = vpop.f32.mrf.mxu0  ;;  %v3596_v57 = vpop.f32.mrf.mxu1 }
 0x3f1   :  { %v4369_v55 = vmul.f32 -1.442695, %v3593_v50  ;;  %v3595_v58 = vadd.f32 %v3594_v49, %v3554_v56  ;;  %v2357_v50 = vrot.slane %v6693_v42, %v2356_v47 }
 0x3f2   :  { %v3556_v59 = vpop.f32.mrf.mxu0  ;;  %v3597_v60 = vpop.f32.mrf.mxu1 }
 0x3f3   :  { %5116 = vpow2.f32 %v4369_v55  ;;  %v4370_v61 = vmul.f32 -1.442695, %v3595_v58 }
 0x3f5   :  { %5118 = vpow2.f32 %v4370_v61 }
 0x400   :  { %v5117_v6 = vpop.eup %5116 }
 0x401   :  { %v3864_v62 = vadd.f32 1.0, %v5117_v6 }
 0x402   :  { %v5119_v63 = vpop.eup %5118 }
 0x403   :  { %5120 = vrcp.f32 %v3864_v62  ;;  %v3865_v10 = vadd.f32 1.0, %v5119_v63 }
 0x405   :  { %5122 = vrcp.f32 %v3865_v10 }
 0x410   :  { %v5121_v0 = vpop.eup %5120 }
 0x411   :  { %3885 = vst [vmem:[#allocation2] sm:$0xff] %v5121_v0 }
 0x412   :  { %v5123_v1 = vpop.eup %5122 }
 0x413   :  { %3886 = vst [vmem:[#allocation2 + $0x8] sm:$0xff] %v5123_v1 }
 0x42c   :  { %v3633_v16 = vpop.f32.mrf.mxu0  ;;  %v3674_v4 = vpop.f32.mrf.mxu1 }
 0x42d   :  { %v3634_v7 = vadd.f32 %v3633_v16, %v2341_v2 }
 0x42e   :  { %v3635_v11 = vpop.f32.mrf.mxu0  ;;  %v3676_v12 = vpop.f32.mrf.mxu1 }
 0x42f   :  { %v3675_v13 = vadd.f32 %v3674_v4, %v3634_v7  ;;  %v3636_v14 = vadd.f32 %v3635_v11, %v2345_v3 }
 0x430   :  { %v3637_v15 = vpop.f32.mrf.mxu0  ;;  %v3678_v17 = vpop.f32.mrf.mxu1 }
 0x431   :  { %v4371_v18 = vmul.f32 -1.442695, %v3675_v13  ;;  %v3677_v21 = vadd.f32 %v3676_v12, %v3636_v14 }
 0x432   :  { %v3638_v22 = vpop.f32.mrf.mxu0  ;;  %v3679_v23 = vpop.f32.mrf.mxu1 }
 0x433   :  { %5124 = vpow2.f32 %v4371_v18  ;;  %v4372_v24 = vmul.f32 -1.442695, %v3677_v21 }
 0x435   :  { %5126 = vpow2.f32 %v4372_v24 }
 0x440   :  { %v5125_v20 = vpop.eup %5124 }
 0x441   :  { %v3866_v51 = vadd.f32 1.0, %v5125_v20 }
 0x442   :  { %v5127_v25 = vpop.eup %5126 }
 0x443   :  { %5128 = vrcp.f32 %v3866_v51  ;;  %v3867_v33 = vadd.f32 1.0, %v5127_v25 }
 0x445   :  { %5130 = vrcp.f32 %v3867_v33 }
 0x450   :  { %v5129_v53 = vpop.eup %5128 }
 0x451   :  { %3887 = vst [vmem:[#allocation2 + $0x10] sm:$0xff] %v5129_v53 }
 0x452   :  { %v5131_v26 = vpop.eup %5130 }
 0x453   :  { %3888 = vst [vmem:[#allocation2 + $0x18] sm:$0xff] %v5131_v26 }
 0x46c   :  { %v3715_v9 = vpop.f32.mrf.mxu0 }
 0x46d   :  { %v3716_v31 = vadd.f32 %v3715_v9, %v2349_v29  ;;  %v3756_v32 = vpop.f32.mrf.mxu1 }
 0x46e   :  { %v3717_v52 = vpop.f32.mrf.mxu0 }
 0x46f   :  { %v3757_v19 = vadd.f32 %v3756_v32, %v3716_v31  ;;  %v3718_v34 = vadd.f32 %v3717_v52, %v2353_v30  ;;  %v3758_v35 = vpop.f32.mrf.mxu1 }
 0x470   :  { %v3719_v8 = vpop.f32.mrf.mxu0 }
 0x471   :  { %v4373_v37 = vmul.f32 -1.442695, %v3757_v19  ;;  %v3759_v38 = vadd.f32 %v3758_v35, %v3718_v34  ;;  %v3760_v39 = vpop.f32.mrf.mxu1 }
 0x472   :  { %v3720_v36 = vpop.f32.mrf.mxu0 }
 0x473   :  { %5132 = vpow2.f32 %v4373_v37  ;;  %v4374_v40 = vmul.f32 -1.442695, %v3759_v38  ;;  %v3761_v41 = vpop.f32.mrf.mxu1 }
 0x475   :  { %5134 = vpow2.f32 %v4374_v40 }
 0x480   :  { %v5133_v43 = vpop.eup %5132 }
 0x481   :  { %v3868_v44 = vadd.f32 1.0, %v5133_v43 }
 0x482   :  { %v5135_v45 = vpop.eup %5134 }
 0x483   :  { %5136 = vrcp.f32 %v3868_v44  ;;  %v3869_v46 = vadd.f32 1.0, %v5135_v45 }
 0x485   :  { %5138 = vrcp.f32 %v3869_v46 }
 0x48c   :  { %v4436_v48 = vpop.f32.mrf.mxu0 }
 0x48d   :  { %v4458_v49 = vpop.f32.mrf.mxu1 }
 0x48e   :  { %v4437_v56 = vpop.f32.mrf.mxu0 }
 0x48f   :  { %v4438_v54 = vadd.f32 %v4437_v56, %v4436_v48  ;;  %v4459_v57 = vpop.f32.mrf.mxu1 }
 0x490   :  { %v5137_v55 = vpop.eup %5136  ;;  %v4439_v58 = vpop.f32.mrf.mxu0  ;;  %v4460_v60 = vadd.f32 %v4459_v57, %v4458_v49 }
 0x491   :  { %3889 = vst [vmem:[#allocation2 + $0x20] sm:$0xff] %v5137_v55  ;;  %v3798_v59 = vadd.f32 %v4438_v54, %v2357_v50  ;;  %v4461_v61 = vpop.f32.mrf.mxu1 }
 0x492   :  { %v5139_v6 = vpop.eup %5138  ;;  %v4440_v62 = vpop.f32.mrf.mxu0 }
 0x493   :  { %3890 = vst [vmem:[#allocation2 + $0x28] sm:$0xff] %v5139_v6  ;;  %v3838_v63 = vadd.f32 %v4460_v60, %v3798_v59  ;;  %v4462_v10 = vpop.f32.mrf.mxu1 }
 0x495   :  { %v4375_v0 = vmul.f32 -1.442695, %v3838_v63 }
 0x497   :  { %5140 = vpow2.f32 %v4375_v0 }
 0x4a4   :  { %v5141_v5 = vpop.eup %5140 }
 0x4a5   :  { %v3870_v1 = vadd.f32 1.0, %v5141_v5 }
 0x4a7   :  { %5142 = vrcp.f32 %v3870_v1 }
 0x4b4   :  { %v5143_v42 = vpop.eup %5142 }
 0x4b5   :  { %3891 = vst.msk [vmem:[#allocation2 + $0x30] sm:$0xff] %vm1246_vm0, %v5143_v42 }
 0x4b6   :  { %5155 = shalt.err (!%p5152_p4)
}
 0x4b7   :  { %3901 = dma.vmem_to_hbm [thread:$0]  %s3899_s8, 896, %s6722_s9, [#allocation3]  }
 0x4b8   :  { %5164 = dma.done.wait [#allocation3], 896  }
 0x4b9   :  { %5165 = vsyncadd [#allocation3], 4294966400 }
 0x4ba   :  { %3905 = vsyncpa [#allocation3], 1 }

</bundles_post_ra>
